<compile_context>
chip_gen: v6e
topology: v6e:2x2x1
jax: 0.10.0
libtpu: 0.0.40
codegen_flags: <defaults>
</compile_context>

<pallas_src>
import functools

import jax
import jax.numpy as jnp
from jax.experimental import pallas as pl
from jax.experimental.pallas import tpu as pltpu

LANE = 128
SUBLANE = 8
BN_EPS = 1e-5


def _round_up(x, m):
    return (x + m - 1) // m * m


# --------------------------- in-kernel helpers -------------------------------

def _conv3x3_shift_acc(buf_ref, w_ref, *, L, Wo, base):
    """3x3 conv (padding=1) as 9 shift-and-accumulate MXU matmuls.

    buf_ref : (FLAT, K) f32 scratch holding the activation in flattened
              (row*Wo + col) layout at rows [base, base+L); zeros elsewhere.
              Zero rows above/below emulate the H zero-padding; W padding is
              emulated by masking the dx=+-1 taps at the image column edges.
    w_ref   : (9, K, CoutP) bf16, tap-major (t = (dy+1)*3 + (dx+1)).
    Returns an (L, CoutP) f32 accumulator.
    """
    col = jax.lax.broadcasted_iota(jnp.int32, (L, 1), 0) % Wo
    left_ok = col >= 1            # dx = -1 falls outside the image at col 0
    right_ok = col <= Wo - 2      # dx = +1 falls outside the image at col Wo-1
    coutp = w_ref.shape[2]
    acc = jnp.zeros((L, coutp), jnp.float32)
    t = 0
    for dy in (-1, 0, 1):
        for dx in (-1, 0, 1):
            off = base + dy * Wo + dx                 # static sublane offset
            tap = buf_ref[pl.ds(off, L), :]           # (L, K) contiguous view
            if dx == -1:
                tap = jnp.where(left_ok, tap, jnp.zeros_like(tap))
            elif dx == 1:
                tap = jnp.where(right_ok, tap, jnp.zeros_like(tap))
            acc = acc + jnp.dot(tap.astype(jnp.bfloat16), w_ref[t],
                                preferred_element_type=jnp.float32)
            t += 1
    return acc


def _tile_stats(acc, n_rows):
    """Per-tile BN partials: row 0 = sum, row 1 = centered sum-of-squares."""
    s = jnp.sum(acc, axis=0, keepdims=True)
    mu = s * (1.0 / n_rows)
    d = acc - mu
    m2 = jnp.sum(d * d, axis=0, keepdims=True)
    pad = jnp.zeros((SUBLANE - 2, acc.shape[1]), jnp.float32)
    return jnp.concatenate([s, m2, pad], axis=0)      # (8, C) sublane-aligned


# -------------------------------- kernels ------------------------------------

def _pool_conv1_kernel(x_ref, w_ref, acc_ref, st_ref, buf_ref, *, Ho, Wo, Cin, base):
    # x_ref  : (Ho, 2, Wo, 2*Cin) bf16 -- one image, 2x2 pool pairs exposed by
    #                                     a contiguous wrapper reshape
    # w_ref  : (9, CinP, CmidP) bf16 tap-major conv1 weights (zero-padded K/N)
    # acc_ref: (L, CmidP) f32 raw conv1 output for this image
    # st_ref : (8, CmidP) f32 per-image BN1 partial sums
    # buf_ref: (FLAT, CinP) f32 flattened zero-padded activation scratch
    L = Ho * Wo
    buf_ref[...] = jnp.zeros(buf_ref.shape, buf_ref.dtype)
    x = x_ref[...]
    m = jnp.maximum(x[:, 0], x[:, 1])                     # pool the H pair (VPU)
    pooled = jnp.maximum(m[:, :, :Cin], m[:, :, Cin:])    # pool the W pair
    pooled = pooled.reshape(L, Cin).astype(jnp.float32)
    kpad = buf_ref.shape[1] - Cin
    buf_ref[pl.ds(base, L), :] = jnp.pad(pooled, ((0, 0), (0, kpad)))
    acc = _conv3x3_shift_acc(buf_ref, w_ref, L=L, Wo=Wo, base=base)
    acc_ref[...] = acc
    st_ref[...] = _tile_stats(acc, L)


def _bn_conv2_kernel(a_ref, sc_ref, sh_ref, w_ref, acc_ref, st_ref, buf_ref, *, Wo, base):
    # a_ref  : (L, CmidP) f32 raw conv1 output; sc/sh: (1, CmidP) folded BN1
    # w_ref  : (9, CmidP, CoutP) bf16 conv2 weights
    # acc_ref: (L, CoutP) f32 raw conv2 output; st_ref: (8, CoutP) BN2 partials
    # buf_ref: (FLAT, CmidP) f32 scratch
    L = a_ref.shape[0]
    buf_ref[...] = jnp.zeros(buf_ref.shape, buf_ref.dtype)
    y = jnp.maximum(a_ref[...] * sc_ref[...] + sh_ref[...], 0.0)   # BN1 + ReLU
    buf_ref[pl.ds(base, L), :] = y
    acc = _conv3x3_shift_acc(buf_ref, w_ref, L=L, Wo=Wo, base=base)
    acc_ref[...] = acc
    st_ref[...] = _tile_stats(acc, L)


def _bn_relu_kernel(a_ref, sc_ref, sh_ref, o_ref):
    # Final BN2 apply + ReLU, lane-dense (CoutP) writeback.
    o_ref[...] = jnp.maximum(a_ref[...] * sc_ref[...] + sh_ref[...], 0.0)


# ------------------------------- wrapper --------------------------------------

def _combine_bn(stats, rows_per_tile, gamma_p, beta_p):
    """Combine per-tile (sum, centered-SS) partials -> folded BN scale/shift."""
    s = stats[:, 0, :]                    # (tiles, C)
    m2 = stats[:, 1, :]                   # (tiles, C)
    tiles = stats.shape[0]
    total = tiles * rows_per_tile
    mean = jnp.sum(s, axis=0) / total
    mean_i = s / rows_per_tile
    var = (jnp.sum(m2, axis=0)
           + rows_per_tile * jnp.sum((mean_i - mean[None, :]) ** 2, axis=0)) / total
    scale = gamma_p * jax.lax.rsqrt(var + BN_EPS)         # biased var (train mode)
    shift = beta_p - mean * scale
    return scale.reshape(1, -1), shift.reshape(1, -1)


@jax.jit
def down_forward(x_nchw, w1_oihw, g1, b1, w2_oihw, g2, b2):
    """Down.forward: MaxPool2d(2) -> (Conv3x3 -> BN -> ReLU) x 2 (NCHW in/out)."""
    N, Cin, H, W = x_nchw.shape
    Cmid, Cout = w1_oihw.shape[0], w2_oihw.shape[0]
    Ho, Wo = H // 2, W // 2
    L = Ho * Wo
    CinP, CmidP, CoutP = (_round_up(c, LANE) for c in (Cin, Cmid, Cout))
    base = _round_up(Wo + 1, SUBLANE)
    flat = _round_up(base + L + Wo + 1, SUBLANE)

    # NCHW -> NHWC (module contract is NCHW in/out); expose the 2x2 pool pairs
    # with a contiguous (free) reshape; bf16 halves the input DMA bytes.
    x = jnp.transpose(x_nchw, (0, 2, 3, 1)).astype(jnp.bfloat16)
    x4 = x.reshape(N * Ho, 2, Wo, 2 * Cin)

    def pack_w(w_oihw, cin, cinp, cout, coutp):
        # OIHW -> (kh, kw, Cin, Cout) -> tap-major (9, CinP, CoutP) bf16, zero-padded.
        w = jnp.transpose(w_oihw, (2, 3, 1, 0)).reshape(9, cin, cout)
        return jnp.zeros((9, cinp, coutp), jnp.bfloat16).at[:, :cin, :cout].set(
            w.astype(jnp.bfloat16))

    def pack_affine(g, b, c, cp):
        gp = jnp.zeros((cp,), jnp.float32).at[:c].set(g.astype(jnp.float32))
        bp = jnp.zeros((cp,), jnp.float32).at[:c].set(b.astype(jnp.float32))
        return gp, bp

    w1p = pack_w(w1_oihw, Cin, CinP, Cmid, CmidP)
    w2p = pack_w(w2_oihw, Cmid, CmidP, Cout, CoutP)
    g1p, b1p = pack_affine(g1, b1, Cmid, CmidP)
    g2p, b2p = pack_affine(g2, b2, Cout, CoutP)

    cparams = pltpu.CompilerParams(dimension_semantics=("parallel",),
                                   vmem_limit_bytes=32 * 1024 * 1024)

    # ---- pass 1: fused 2x2 maxpool + conv1 (raw) + per-image BN1 partials ----
    acc1, st1 = pl.pallas_call(
        functools.partial(_pool_conv1_kernel, Ho=Ho, Wo=Wo, Cin=Cin, base=base),
        grid=(N,),
        in_specs=[pl.BlockSpec((Ho, 2, Wo, 2 * Cin), lambda n: (n, 0, 0, 0)),
                  pl.BlockSpec((9, CinP, CmidP), lambda n: (0, 0, 0))],
        out_specs=(pl.BlockSpec((L, CmidP), lambda n: (n, 0)),
                   pl.BlockSpec((SUBLANE, CmidP), lambda n: (n, 0))),
        out_shape=(jax.ShapeDtypeStruct((N * L, CmidP), jnp.float32),
                   jax.ShapeDtypeStruct((N * SUBLANE, CmidP), jnp.float32)),
        scratch_shapes=[pltpu.VMEM((flat, CinP), jnp.float32)],
        compiler_params=cparams,
    )(x4, w1p)

    sc1, sh1 = _combine_bn(st1.reshape(N, SUBLANE, CmidP), L, g1p, b1p)

    # ---- pass 2: BN1 apply + ReLU + conv2 (raw) + per-image BN2 partials -----
    acc2, st2 = pl.pallas_call(
        functools.partial(_bn_conv2_kernel, Wo=Wo, base=base),
        grid=(N,),
        in_specs=[pl.BlockSpec((L, CmidP), lambda n: (n, 0)),
                  pl.BlockSpec((1, CmidP), lambda n: (0, 0)),
                  pl.BlockSpec((1, CmidP), lambda n: (0, 0)),
                  pl.BlockSpec((9, CmidP, CoutP), lambda n: (0, 0, 0))],
        out_specs=(pl.BlockSpec((L, CoutP), lambda n: (n, 0)),
                   pl.BlockSpec((SUBLANE, CoutP), lambda n: (n, 0))),
        out_shape=(jax.ShapeDtypeStruct((N * L, CoutP), jnp.float32),
                   jax.ShapeDtypeStruct((N * SUBLANE, CoutP), jnp.float32)),
        scratch_shapes=[pltpu.VMEM((flat, CmidP), jnp.float32)],
        compiler_params=cparams,
    )(acc1, sc1, sh1, w2p)

    sc2, sh2 = _combine_bn(st2.reshape(N, SUBLANE, CoutP), L, g2p, b2p)

    # ---- pass 3: BN2 apply + ReLU (lane-dense writeback) ---------------------
    out_flat = pl.pallas_call(
        _bn_relu_kernel,
        grid=(N,),
        in_specs=[pl.BlockSpec((L, CoutP), lambda n: (n, 0)),
                  pl.BlockSpec((1, CoutP), lambda n: (0, 0)),
                  pl.BlockSpec((1, CoutP), lambda n: (0, 0))],
        out_specs=pl.BlockSpec((L, CoutP), lambda n: (n, 0)),
        out_shape=jax.ShapeDtypeStruct((N * L, CoutP), jnp.float32),
        compiler_params=cparams,
    )(acc2, sc2, sh2)

    out = out_flat.reshape(N, Ho, Wo, CoutP)[:, :, :, :Cout]
    return jnp.transpose(out, (0, 3, 1, 2))               # -> NCHW


# ------------------------- pure-JAX f32 reference ----------------------------

def _conv_bn_relu_ref(x_nchw, w_oihw, gamma, beta):
    y = jax.lax.conv_general_dilated(
        x_nchw, w_oihw, window_strides=(1, 1), padding=((1, 1), (1, 1)),
        dimension_numbers=('NCHW', 'OIHW', 'NCHW'))
    mean = jnp.mean(y, axis=(0, 2, 3), keepdims=True)
    var = jnp.mean((y - mean) ** 2, axis=(0, 2, 3), keepdims=True)
    y = ((y - mean) * jax.lax.rsqrt(var + BN_EPS)
         * gamma.reshape(1, -1, 1, 1) + beta.reshape(1, -1, 1, 1))
    return jnp.maximum(y, 0.0)


def down_ref(x_nchw, w1_oihw, g1, b1, w2_oihw, g2, b2):
    p = jax.lax.reduce_window(x_nchw, -jnp.inf, jax.lax.max,
                              (1, 1, 2, 2), (1, 1, 2, 2), 'VALID')
    h = _conv_bn_relu_ref(p, w1_oihw, g1, b1)
    return _conv_bn_relu_ref(h, w2_oihw, g2, b2)


# ---------------------------------- main -------------------------------------

if __name__ == "__main__":
    N, Cin, H, W = 2, 4, 16, 16
    Cout = 8          # out_channels; mid_channels defaults to out_channels

    key = jax.random.PRNGKey(0)
    kx, kw1, kw2, kg1, kb1, kg2, kb2 = jax.random.split(key, 7)

    x = jax.random.normal(kx, (N, Cin, H, W), jnp.float32)
    w1_oihw = 0.2 * jax.random.normal(kw1, (Cout, Cin, 3, 3), jnp.float32)
    w2_oihw = 0.2 * jax.random.normal(kw2, (Cout, Cout, 3, 3), jnp.float32)
    g1 = 1.0 + 0.1 * jax.random.normal(kg1, (Cout,), jnp.float32)
    b1 = 0.1 * jax.random.normal(kb1, (Cout,), jnp.float32)
    g2 = 1.0 + 0.1 * jax.random.normal(kg2, (Cout,), jnp.float32)
    b2 = 0.1 * jax.random.normal(kb2, (Cout,), jnp.float32)

    out = jax.block_until_ready(down_forward(x, w1_oihw, g1, b1, w2_oihw, g2, b2))
    ref = down_ref(x, w1_oihw, g1, b1, w2_oihw, g2, b2)

    assert out.shape == (N, Cout, H // 2, W // 2), out.shape
    # bf16 input/weights/mid-activation on the MXU (f32 accumulation) vs. an
    # exact f32 reference -> tolerance relaxed accordingly.
    max_err = float(jnp.max(jnp.abs(out - ref)))
    assert jnp.allclose(out, ref, atol=7e-2, rtol=7e-2), max_err

    print("KERNEL_OK")
</pallas_src>

<mosaic_0001>
module attributes {stable_mosaic.version = 11 : i64} {
  func.func @_pool_conv1_kernel(%arg0: i32, %arg1: memref<8x2x8x8xbf16, #tpu.memory_space<vmem>>, %arg2: memref<9x128x128xbf16, #tpu.memory_space<vmem>>, %arg3: memref<64x128xf32, #tpu.memory_space<vmem>>, %arg4: memref<8x128xf32, #tpu.memory_space<vmem>>, %arg5: memref<96x128xf32, #tpu.memory_space<vmem>>) attributes {dimension_semantics = [#tpu.dimension_semantics<parallel>], iteration_bounds = array<i64: 2>, scalar_prefetch = 0 : i64, scratch_operands = 1 : i64, tpu.core_type = #tpu.core_type<tc>, window_params = [{transform_indices = @transform_0, window_bounds = array<i64: 8, 2, 8, 8>}, {pipeline_mode = #tpu.pipeline_mode<synchronous>, transform_indices = @transform_1, window_bounds = array<i64: 9, 128, 128>}, {transform_indices = @transform_2, window_bounds = array<i64: 64, 128>}, {transform_indices = @transform_3, window_bounds = array<i64: 8, 128>}]} {
    %cst = arith.constant 0.000000e+00 : f32
    %0 = vector.broadcast %cst : f32 to vector<96x128xf32>
    %c0 = arith.constant 0 : index
    %c0_0 = arith.constant 0 : index
    %1 = vector.load %arg5[%c0, %c0_0] : memref<96x128xf32, #tpu.memory_space<vmem>>, vector<96x128xf32>
    tpu.vector_store %arg5[%c0, %c0_0], %0 {strides = array<i32>} : memref<96x128xf32, #tpu.memory_space<vmem>>, vector<96x128xf32>,
    %c0_1 = arith.constant 0 : index
    %c0_2 = arith.constant 0 : index
    %c0_3 = arith.constant 0 : index
    %c0_4 = arith.constant 0 : index
    %2 = vector.load %arg1[%c0_1, %c0_2, %c0_3, %c0_4] : memref<8x2x8x8xbf16, #tpu.memory_space<vmem>>, vector<8x2x8x8xbf16>
    %3 = vector.extract_strided_slice %2 {offsets = [0, 0, 0, 0], sizes = [8, 1, 8, 8], strides = [1, 1, 1, 1]} : vector<8x2x8x8xbf16> to vector<8x1x8x8xbf16>
    %4 = vector.shape_cast %3 : vector<8x1x8x8xbf16> to vector<8x8x8xbf16>
    %5 = vector.extract_strided_slice %2 {offsets = [0, 1, 0, 0], sizes = [8, 1, 8, 8], strides = [1, 1, 1, 1]} : vector<8x2x8x8xbf16> to vector<8x1x8x8xbf16>
    %6 = vector.shape_cast %5 : vector<8x1x8x8xbf16> to vector<8x8x8xbf16>
    %7 = arith.maximumf %4, %6 : vector<8x8x8xbf16>
    %8 = vector.extract_strided_slice %7 {offsets = [0, 0, 0], sizes = [8, 8, 4], strides = [1, 1, 1]} : vector<8x8x8xbf16> to vector<8x8x4xbf16>
    %9 = vector.extract_strided_slice %7 {offsets = [0, 0, 4], sizes = [8, 8, 4], strides = [1, 1, 1]} : vector<8x8x8xbf16> to vector<8x8x4xbf16>
    %10 = arith.maximumf %8, %9 : vector<8x8x4xbf16>
    %11 = vector.shape_cast %10 : vector<8x8x4xbf16> to vector<64x4xbf16>
    %12 = arith.extf %11 : vector<64x4xbf16> to vector<64x4xf32>
    %c0_i32 = arith.constant 0 : i32
    %13 = arith.sitofp %c0_i32 : i32 to f32
    %14 = vector.broadcast %13 : f32 to vector<64x124xf32>
    %15 = tpu.concatenate %12, %14 in 1 : vector<64x4xf32>, vector<64x124xf32> -> vector<64x128xf32>
    %c16 = arith.constant 16 : index
    %c0_5 = arith.constant 0 : index
    %16 = vector.load %arg5[%c16, %c0_5] : memref<96x128xf32, #tpu.memory_space<vmem>>, vector<64x128xf32>
    tpu.vector_store %arg5[%c16, %c0_5], %15 {strides = array<i32>} : memref<96x128xf32, #tpu.memory_space<vmem>>, vector<64x128xf32>,
    %17 = tpu.iota {dimensions = array<i32: 0>} : vector<64x1xi32>
    %c8_i32 = arith.constant 8 : i32
    %c0_i32_6 = arith.constant 0 : i32
    %18 = arith.cmpi eq, %c8_i32, %c0_i32_6 : i32
    %c1_i32 = arith.constant 1 : i32
    %19 = arith.select %18, %c1_i32, %c8_i32 : i32
    %20 = vector.broadcast %19 : i32 to vector<64x1xi32>
    %21 = arith.remsi %17, %20 : vector<64x1xi32>
    %c0_i32_7 = arith.constant 0 : i32
    %22 = vector.broadcast %c0_i32_7 : i32 to vector<64x1xi32>
    %23 = arith.cmpi ne, %21, %22 : vector<64x1xi32>
    %c0_i32_8 = arith.constant 0 : i32
    %24 = vector.broadcast %c0_i32_8 : i32 to vector<64x1xi32>
    %25 = arith.cmpi slt, %21, %24 : vector<64x1xi32>
    %c0_i32_9 = arith.constant 0 : i32
    %26 = arith.cmpi slt, %19, %c0_i32_9 : i32
    %27 = vector.broadcast %26 : i1 to vector<64x1xi1>
    %28 = vector.broadcast %27 : vector<64x1xi1> to vector<64x1xi1>
    %29 = arith.xori %25, %28 : vector<64x1xi1>
    %30 = arith.andi %29, %23 : vector<64x1xi1>
    %31 = vector.broadcast %19 : i32 to vector<64x1xi32>
    %32 = arith.addi %21, %31 : vector<64x1xi32>
    %33 = arith.select %30, %32, %21 : vector<64x1xi1>, vector<64x1xi32>
    %c1_i32_10 = arith.constant 1 : i32
    %34 = vector.broadcast %c1_i32_10 : i32 to vector<64x1xi32>
    %35 = arith.cmpi sge, %33, %34 : vector<64x1xi32>
    %c6_i32 = arith.constant 6 : i32
    %36 = vector.broadcast %c6_i32 : i32 to vector<64x1xi32>
    %37 = arith.cmpi sle, %33, %36 : vector<64x1xi32>
    %cst_11 = arith.constant 0.000000e+00 : f32
    %38 = vector.broadcast %cst_11 : f32 to vector<64x128xf32>
    %c7 = arith.constant 7 : index
    %c0_12 = arith.constant 0 : index
    %39 = vector.load %arg5[%c7, %c0_12] : memref<96x128xf32, #tpu.memory_space<vmem>>, vector<64x128xf32>
    %cst_13 = arith.constant 0.000000e+00 : f32
    %40 = vector.broadcast %cst_13 : f32 to vector<64x128xf32>
    %41 = vector.shape_cast %35 : vector<64x1xi1> to vector<64x1xi1>
    %42 = vector.broadcast %41 : vector<64x1xi1> to vector<64x128xi1>
    %43 = arith.select %42, %39, %40 : vector<64x128xi1>, vector<64x128xf32>
    %44 = arith.truncf %43 : vector<64x128xf32> to vector<64x128xbf16>
    %c0_14 = arith.constant 0 : index
    %c0_15 = arith.constant 0 : index
    %c0_16 = arith.constant 0 : index
    %45 = vector.load %arg2[%c0_14, %c0_15, %c0_16] : memref<9x128x128xbf16, #tpu.memory_space<vmem>>, vector<1x128x128xbf16>
    %46 = vector.shape_cast %45 : vector<1x128x128xbf16> to vector<128x128xbf16>
    %cst_17 = arith.constant dense<0.000000e+00> : vector<64x128xf32>
    %47 = tpu.matmul %44, %46, %cst_17 {dimension_numbers = #tpu.dot_dimension_numbers<[1], [0], [0], [1], [0, 0, 1, 1], [], []>} : vector<64x128xbf16>, vector<128x128xbf16>, vector<64x128xf32> -> vector<64x128xf32>
    %48 = arith.addf %38, %47 : vector<64x128xf32>
    %c8 = arith.constant 8 : index
    %c0_18 = arith.constant 0 : index
    %49 = vector.load %arg5[%c8, %c0_18] : memref<96x128xf32, #tpu.memory_space<vmem>>, vector<64x128xf32>
    %50 = arith.truncf %49 : vector<64x128xf32> to vector<64x128xbf16>
    %c1 = arith.constant 1 : index
    %c0_19 = arith.constant 0 : index
    %c0_20 = arith.constant 0 : index
    %51 = vector.load %arg2[%c1, %c0_19, %c0_20] : memref<9x128x128xbf16, #tpu.memory_space<vmem>>, vector<1x128x128xbf16>
    %52 = vector.shape_cast %51 : vector<1x128x128xbf16> to vector<128x128xbf16>
    %cst_21 = arith.constant dense<0.000000e+00> : vector<64x128xf32>
    %53 = tpu.matmul %50, %52, %cst_21 {dimension_numbers = #tpu.dot_dimension_numbers<[1], [0], [0], [1], [0, 0, 1, 1], [], []>} : vector<64x128xbf16>, vector<128x128xbf16>, vector<64x128xf32> -> vector<64x128xf32>
    %54 = arith.addf %48, %53 : vector<64x128xf32>
    %c9 = arith.constant 9 : index
    %c0_22 = arith.constant 0 : index
    %55 = vector.load %arg5[%c9, %c0_22] : memref<96x128xf32, #tpu.memory_space<vmem>>, vector<64x128xf32>
    %cst_23 = arith.constant 0.000000e+00 : f32
    %56 = vector.broadcast %cst_23 : f32 to vector<64x128xf32>
    %57 = vector.shape_cast %37 : vector<64x1xi1> to vector<64x1xi1>
    %58 = vector.broadcast %57 : vector<64x1xi1> to vector<64x128xi1>
    %59 = arith.select %58, %55, %56 : vector<64x128xi1>, vector<64x128xf32>
    %60 = arith.truncf %59 : vector<64x128xf32> to vector<64x128xbf16>
    %c2 = arith.constant 2 : index
    %c0_24 = arith.constant 0 : index
    %c0_25 = arith.constant 0 : index
    %61 = vector.load %arg2[%c2, %c0_24, %c0_25] : memref<9x128x128xbf16, #tpu.memory_space<vmem>>, vector<1x128x128xbf16>
    %62 = vector.shape_cast %61 : vector<1x128x128xbf16> to vector<128x128xbf16>
    %cst_26 = arith.constant dense<0.000000e+00> : vector<64x128xf32>
    %63 = tpu.matmul %60, %62, %cst_26 {dimension_numbers = #tpu.dot_dimension_numbers<[1], [0], [0], [1], [0, 0, 1, 1], [], []>} : vector<64x128xbf16>, vector<128x128xbf16>, vector<64x128xf32> -> vector<64x128xf32>
    %64 = arith.addf %54, %63 : vector<64x128xf32>
    %c15 = arith.constant 15 : index
    %c0_27 = arith.constant 0 : index
    %65 = vector.load %arg5[%c15, %c0_27] : memref<96x128xf32, #tpu.memory_space<vmem>>, vector<64x128xf32>
    %cst_28 = arith.constant 0.000000e+00 : f32
    %66 = vector.broadcast %cst_28 : f32 to vector<64x128xf32>
    %67 = vector.shape_cast %35 : vector<64x1xi1> to vector<64x1xi1>
    %68 = vector.broadcast %67 : vector<64x1xi1> to vector<64x128xi1>
    %69 = arith.select %68, %65, %66 : vector<64x128xi1>, vector<64x128xf32>
    %70 = arith.truncf %69 : vector<64x128xf32> to vector<64x128xbf16>
    %c3 = arith.constant 3 : index
    %c0_29 = arith.constant 0 : index
    %c0_30 = arith.constant 0 : index
    %71 = vector.load %arg2[%c3, %c0_29, %c0_30] : memref<9x128x128xbf16, #tpu.memory_space<vmem>>, vector<1x128x128xbf16>
    %72 = vector.shape_cast %71 : vector<1x128x128xbf16> to vector<128x128xbf16>
    %cst_31 = arith.constant dense<0.000000e+00> : vector<64x128xf32>
    %73 = tpu.matmul %70, %72, %cst_31 {dimension_numbers = #tpu.dot_dimension_numbers<[1], [0], [0], [1], [0, 0, 1, 1], [], []>} : vector<64x128xbf16>, vector<128x128xbf16>, vector<64x128xf32> -> vector<64x128xf32>
    %74 = arith.addf %64, %73 : vector<64x128xf32>
    %c16_32 = arith.constant 16 : index
    %c0_33 = arith.constant 0 : index
    %75 = vector.load %arg5[%c16_32, %c0_33] : memref<96x128xf32, #tpu.memory_space<vmem>>, vector<64x128xf32>
    %76 = arith.truncf %75 : vector<64x128xf32> to vector<64x128xbf16>
    %c4 = arith.constant 4 : index
    %c0_34 = arith.constant 0 : index
    %c0_35 = arith.constant 0 : index
    %77 = vector.load %arg2[%c4, %c0_34, %c0_35] : memref<9x128x128xbf16, #tpu.memory_space<vmem>>, vector<1x128x128xbf16>
    %78 = vector.shape_cast %77 : vector<1x128x128xbf16> to vector<128x128xbf16>
    %cst_36 = arith.constant dense<0.000000e+00> : vector<64x128xf32>
    %79 = tpu.matmul %76, %78, %cst_36 {dimension_numbers = #tpu.dot_dimension_numbers<[1], [0], [0], [1], [0, 0, 1, 1], [], []>} : vector<64x128xbf16>, vector<128x128xbf16>, vector<64x128xf32> -> vector<64x128xf32>
    %80 = arith.addf %74, %79 : vector<64x128xf32>
    %c17 = arith.constant 17 : index
    %c0_37 = arith.constant 0 : index
    %81 = vector.load %arg5[%c17, %c0_37] : memref<96x128xf32, #tpu.memory_space<vmem>>, vector<64x128xf32>
    %cst_38 = arith.constant 0.000000e+00 : f32
    %82 = vector.broadcast %cst_38 : f32 to vector<64x128xf32>
    %83 = vector.shape_cast %37 : vector<64x1xi1> to vector<64x1xi1>
    %84 = vector.broadcast %83 : vector<64x1xi1> to vector<64x128xi1>
    %85 = arith.select %84, %81, %82 : vector<64x128xi1>, vector<64x128xf32>
    %86 = arith.truncf %85 : vector<64x128xf32> to vector<64x128xbf16>
    %c5 = arith.constant 5 : index
    %c0_39 = arith.constant 0 : index
    %c0_40 = arith.constant 0 : index
    %87 = vector.load %arg2[%c5, %c0_39, %c0_40] : memref<9x128x128xbf16, #tpu.memory_space<vmem>>, vector<1x128x128xbf16>
    %88 = vector.shape_cast %87 : vector<1x128x128xbf16> to vector<128x128xbf16>
    %cst_41 = arith.constant dense<0.000000e+00> : vector<64x128xf32>
    %89 = tpu.matmul %86, %88, %cst_41 {dimension_numbers = #tpu.dot_dimension_numbers<[1], [0], [0], [1], [0, 0, 1, 1], [], []>} : vector<64x128xbf16>, vector<128x128xbf16>, vector<64x128xf32> -> vector<64x128xf32>
    %90 = arith.addf %80, %89 : vector<64x128xf32>
    %c23 = arith.constant 23 : index
    %c0_42 = arith.constant 0 : index
    %91 = vector.load %arg5[%c23, %c0_42] : memref<96x128xf32, #tpu.memory_space<vmem>>, vector<64x128xf32>
    %cst_43 = arith.constant 0.000000e+00 : f32
    %92 = vector.broadcast %cst_43 : f32 to vector<64x128xf32>
    %93 = vector.shape_cast %35 : vector<64x1xi1> to vector<64x1xi1>
    %94 = vector.broadcast %93 : vector<64x1xi1> to vector<64x128xi1>
    %95 = arith.select %94, %91, %92 : vector<64x128xi1>, vector<64x128xf32>
    %96 = arith.truncf %95 : vector<64x128xf32> to vector<64x128xbf16>
    %c6 = arith.constant 6 : index
    %c0_44 = arith.constant 0 : index
    %c0_45 = arith.constant 0 : index
    %97 = vector.load %arg2[%c6, %c0_44, %c0_45] : memref<9x128x128xbf16, #tpu.memory_space<vmem>>, vector<1x128x128xbf16>
    %98 = vector.shape_cast %97 : vector<1x128x128xbf16> to vector<128x128xbf16>
    %cst_46 = arith.constant dense<0.000000e+00> : vector<64x128xf32>
    %99 = tpu.matmul %96, %98, %cst_46 {dimension_numbers = #tpu.dot_dimension_numbers<[1], [0], [0], [1], [0, 0, 1, 1], [], []>} : vector<64x128xbf16>, vector<128x128xbf16>, vector<64x128xf32> -> vector<64x128xf32>
    %100 = arith.addf %90, %99 : vector<64x128xf32>
    %c24 = arith.constant 24 : index
    %c0_47 = arith.constant 0 : index
    %101 = vector.load %arg5[%c24, %c0_47] : memref<96x128xf32, #tpu.memory_space<vmem>>, vector<64x128xf32>
    %102 = arith.truncf %101 : vector<64x128xf32> to vector<64x128xbf16>
    %c7_48 = arith.constant 7 : index
    %c0_49 = arith.constant 0 : index
    %c0_50 = arith.constant 0 : index
    %103 = vector.load %arg2[%c7_48, %c0_49, %c0_50] : memref<9x128x128xbf16, #tpu.memory_space<vmem>>, vector<1x128x128xbf16>
    %104 = vector.shape_cast %103 : vector<1x128x128xbf16> to vector<128x128xbf16>
    %cst_51 = arith.constant dense<0.000000e+00> : vector<64x128xf32>
    %105 = tpu.matmul %102, %104, %cst_51 {dimension_numbers = #tpu.dot_dimension_numbers<[1], [0], [0], [1], [0, 0, 1, 1], [], []>} : vector<64x128xbf16>, vector<128x128xbf16>, vector<64x128xf32> -> vector<64x128xf32>
    %106 = arith.addf %100, %105 : vector<64x128xf32>
    %c25 = arith.constant 25 : index
    %c0_52 = arith.constant 0 : index
    %107 = vector.load %arg5[%c25, %c0_52] : memref<96x128xf32, #tpu.memory_space<vmem>>, vector<64x128xf32>
    %cst_53 = arith.constant 0.000000e+00 : f32
    %108 = vector.broadcast %cst_53 : f32 to vector<64x128xf32>
    %109 = vector.shape_cast %37 : vector<64x1xi1> to vector<64x1xi1>
    %110 = vector.broadcast %109 : vector<64x1xi1> to vector<64x128xi1>
    %111 = arith.select %110, %107, %108 : vector<64x128xi1>, vector<64x128xf32>
    %112 = arith.truncf %111 : vector<64x128xf32> to vector<64x128xbf16>
    %c8_54 = arith.constant 8 : index
    %c0_55 = arith.constant 0 : index
    %c0_56 = arith.constant 0 : index
    %113 = vector.load %arg2[%c8_54, %c0_55, %c0_56] : memref<9x128x128xbf16, #tpu.memory_space<vmem>>, vector<1x128x128xbf16>
    %114 = vector.shape_cast %113 : vector<1x128x128xbf16> to vector<128x128xbf16>
    %cst_57 = arith.constant dense<0.000000e+00> : vector<64x128xf32>
    %115 = tpu.matmul %112, %114, %cst_57 {dimension_numbers = #tpu.dot_dimension_numbers<[1], [0], [0], [1], [0, 0, 1, 1], [], []>} : vector<64x128xbf16>, vector<128x128xbf16>, vector<64x128xf32> -> vector<64x128xf32>
    %116 = arith.addf %106, %115 : vector<64x128xf32>
    %c0_58 = arith.constant 0 : index
    %c0_59 = arith.constant 0 : index
    %117 = vector.load %arg3[%c0_58, %c0_59] : memref<64x128xf32, #tpu.memory_space<vmem>>, vector<64x128xf32>
    tpu.vector_store %arg3[%c0_58, %c0_59], %116 {strides = array<i32>} : memref<64x128xf32, #tpu.memory_space<vmem>>, vector<64x128xf32>,
    %cst_60 = arith.constant dense<0.000000e+00> : vector<128xf32>
    %118 = vector.multi_reduction <add>, %116, %cst_60 [0] : vector<64x128xf32> to vector<128xf32>
    %119 = vector.shape_cast %118 : vector<128xf32> to vector<1x128xf32>
    %cst_61 = arith.constant 1.562500e-02 : f32
    %120 = vector.broadcast %cst_61 : f32 to vector<1x128xf32>
    %121 = arith.mulf %119, %120 : vector<1x128xf32>
    %122 = vector.broadcast %121 : vector<1x128xf32> to vector<64x128xf32>
    %123 = arith.subf %116, %122 : vector<64x128xf32>
    %124 = arith.mulf %123, %123 : vector<64x128xf32>
    %cst_62 = arith.constant dense<0.000000e+00> : vector<128xf32>
    %125 = vector.multi_reduction <add>, %124, %cst_62 [0] : vector<64x128xf32> to vector<128xf32>
    %126 = vector.shape_cast %125 : vector<128xf32> to vector<1x128xf32>
    %cst_63 = arith.constant 0.000000e+00 : f32
    %127 = vector.broadcast %cst_63 : f32 to vector<6x128xf32>
    %128 = tpu.concatenate %119, %126, %127 in 0 : vector<1x128xf32>, vector<1x128xf32>, vector<6x128xf32> -> vector<8x128xf32>
    %c0_64 = arith.constant 0 : index
    %c0_65 = arith.constant 0 : index
    %129 = vector.load %arg4[%c0_64, %c0_65] : memref<8x128xf32, #tpu.memory_space<vmem>>, vector<8x128xf32>
    tpu.vector_store %arg4[%c0_64, %c0_65], %128 {strides = array<i32>} : memref<8x128xf32, #tpu.memory_space<vmem>>, vector<8x128xf32>,
    return
  }
  func.func @transform_0(%arg0: i32) -> (i32, i32, i32, i32) {
    %c0_i32 = arith.constant 0 : i32
    %c0_i32_0 = arith.constant 0 : i32
    %c0_i32_1 = arith.constant 0 : i32
    %c0_i32_2 = arith.constant 0 : i32
    return %arg0, %c0_i32, %c0_i32_0, %c0_i32_1 : i32, i32, i32, i32
  }
  func.func @transform_1(%arg0: i32) -> (i32, i32, i32) {
    %c0_i32 = arith.constant 0 : i32
    %c0_i32_0 = arith.constant 0 : i32
    %c0_i32_1 = arith.constant 0 : i32
    %c0_i32_2 = arith.constant 0 : i32
    return %c0_i32, %c0_i32_0, %c0_i32_1 : i32, i32, i32
  }
  func.func @transform_2(%arg0: i32) -> (i32, i32) {
    %c0_i32 = arith.constant 0 : i32
    %c0_i32_0 = arith.constant 0 : i32
    return %arg0, %c0_i32 : i32, i32
  }
  func.func @transform_3(%arg0: i32) -> (i32, i32) {
    %c0_i32 = arith.constant 0 : i32
    %c0_i32_0 = arith.constant 0 : i32
    return %arg0, %c0_i32 : i32, i32
  }
}

module attributes {stable_mosaic.version = 11 : i64} {
  func.func @_bn_conv2_kernel(%arg0: i32, %arg1: memref<64x128xf32, #tpu.memory_space<vmem>>, %arg2: memref<1x128xf32, #tpu.memory_space<vmem>>, %arg3: memref<1x128xf32, #tpu.memory_space<vmem>>, %arg4: memref<9x128x128xbf16, #tpu.memory_space<vmem>>, %arg5: memref<64x128xf32, #tpu.memory_space<vmem>>, %arg6: memref<8x128xf32, #tpu.memory_space<vmem>>, %arg7: memref<96x128xf32, #tpu.memory_space<vmem>>) attributes {dimension_semantics = [#tpu.dimension_semantics<parallel>], iteration_bounds = array<i64: 2>, scalar_prefetch = 0 : i64, scratch_operands = 1 : i64, tpu.core_type = #tpu.core_type<tc>, window_params = [{transform_indices = @transform_0, window_bounds = array<i64: 64, 128>}, {pipeline_mode = #tpu.pipeline_mode<synchronous>, transform_indices = @transform_1, window_bounds = array<i64: 1, 128>}, {pipeline_mode = #tpu.pipeline_mode<synchronous>, transform_indices = @transform_2, window_bounds = array<i64: 1, 128>}, {pipeline_mode = #tpu.pipeline_mode<synchronous>, transform_indices = @transform_3, window_bounds = array<i64: 9, 128, 128>}, {transform_indices = @transform_4, window_bounds = array<i64: 64, 128>}, {transform_indices = @transform_5, window_bounds = array<i64: 8, 128>}]} {
    %cst = arith.constant 0.000000e+00 : f32
    %0 = vector.broadcast %cst : f32 to vector<96x128xf32>
    %c0 = arith.constant 0 : index
    %c0_0 = arith.constant 0 : index
    %1 = vector.load %arg7[%c0, %c0_0] : memref<96x128xf32, #tpu.memory_space<vmem>>, vector<96x128xf32>
    tpu.vector_store %arg7[%c0, %c0_0], %0 {strides = array<i32>} : memref<96x128xf32, #tpu.memory_space<vmem>>, vector<96x128xf32>,
    %c0_1 = arith.constant 0 : index
    %c0_2 = arith.constant 0 : index
    %2 = vector.load %arg1[%c0_1, %c0_2] : memref<64x128xf32, #tpu.memory_space<vmem>>, vector<64x128xf32>
    %c0_3 = arith.constant 0 : index
    %c0_4 = arith.constant 0 : index
    %3 = vector.load %arg2[%c0_3, %c0_4] : memref<1x128xf32, #tpu.memory_space<vmem>>, vector<1x128xf32>
    %4 = vector.broadcast %3 : vector<1x128xf32> to vector<64x128xf32>
    %5 = arith.mulf %2, %4 : vector<64x128xf32>
    %c0_5 = arith.constant 0 : index
    %c0_6 = arith.constant 0 : index
    %6 = vector.load %arg3[%c0_5, %c0_6] : memref<1x128xf32, #tpu.memory_space<vmem>>, vector<1x128xf32>
    %7 = vector.broadcast %6 : vector<1x128xf32> to vector<64x128xf32>
    %8 = arith.addf %5, %7 : vector<64x128xf32>
    %cst_7 = arith.constant 0.000000e+00 : f32
    %9 = vector.broadcast %cst_7 : f32 to vector<64x128xf32>
    %10 = arith.maximumf %8, %9 : vector<64x128xf32>
    %c16 = arith.constant 16 : index
    %c0_8 = arith.constant 0 : index
    %11 = vector.load %arg7[%c16, %c0_8] : memref<96x128xf32, #tpu.memory_space<vmem>>, vector<64x128xf32>
    tpu.vector_store %arg7[%c16, %c0_8], %10 {strides = array<i32>} : memref<96x128xf32, #tpu.memory_space<vmem>>, vector<64x128xf32>,
    %12 = tpu.iota {dimensions = array<i32: 0>} : vector<64x1xi32>
    %c8_i32 = arith.constant 8 : i32
    %c0_i32 = arith.constant 0 : i32
    %13 = arith.cmpi eq, %c8_i32, %c0_i32 : i32
    %c1_i32 = arith.constant 1 : i32
    %14 = arith.select %13, %c1_i32, %c8_i32 : i32
    %15 = vector.broadcast %14 : i32 to vector<64x1xi32>
    %16 = arith.remsi %12, %15 : vector<64x1xi32>
    %c0_i32_9 = arith.constant 0 : i32
    %17 = vector.broadcast %c0_i32_9 : i32 to vector<64x1xi32>
    %18 = arith.cmpi ne, %16, %17 : vector<64x1xi32>
    %c0_i32_10 = arith.constant 0 : i32
    %19 = vector.broadcast %c0_i32_10 : i32 to vector<64x1xi32>
    %20 = arith.cmpi slt, %16, %19 : vector<64x1xi32>
    %c0_i32_11 = arith.constant 0 : i32
    %21 = arith.cmpi slt, %14, %c0_i32_11 : i32
    %22 = vector.broadcast %21 : i1 to vector<64x1xi1>
    %23 = vector.broadcast %22 : vector<64x1xi1> to vector<64x1xi1>
    %24 = arith.xori %20, %23 : vector<64x1xi1>
    %25 = arith.andi %24, %18 : vector<64x1xi1>
    %26 = vector.broadcast %14 : i32 to vector<64x1xi32>
    %27 = arith.addi %16, %26 : vector<64x1xi32>
    %28 = arith.select %25, %27, %16 : vector<64x1xi1>, vector<64x1xi32>
    %c1_i32_12 = arith.constant 1 : i32
    %29 = vector.broadcast %c1_i32_12 : i32 to vector<64x1xi32>
    %30 = arith.cmpi sge, %28, %29 : vector<64x1xi32>
    %c6_i32 = arith.constant 6 : i32
    %31 = vector.broadcast %c6_i32 : i32 to vector<64x1xi32>
    %32 = arith.cmpi sle, %28, %31 : vector<64x1xi32>
    %cst_13 = arith.constant 0.000000e+00 : f32
    %33 = vector.broadcast %cst_13 : f32 to vector<64x128xf32>
    %c7 = arith.constant 7 : index
    %c0_14 = arith.constant 0 : index
    %34 = vector.load %arg7[%c7, %c0_14] : memref<96x128xf32, #tpu.memory_space<vmem>>, vector<64x128xf32>
    %cst_15 = arith.constant 0.000000e+00 : f32
    %35 = vector.broadcast %cst_15 : f32 to vector<64x128xf32>
    %36 = vector.shape_cast %30 : vector<64x1xi1> to vector<64x1xi1>
    %37 = vector.broadcast %36 : vector<64x1xi1> to vector<64x128xi1>
    %38 = arith.select %37, %34, %35 : vector<64x128xi1>, vector<64x128xf32>
    %39 = arith.truncf %38 : vector<64x128xf32> to vector<64x128xbf16>
    %c0_16 = arith.constant 0 : index
    %c0_17 = arith.constant 0 : index
    %c0_18 = arith.constant 0 : index
    %40 = vector.load %arg4[%c0_16, %c0_17, %c0_18] : memref<9x128x128xbf16, #tpu.memory_space<vmem>>, vector<1x128x128xbf16>
    %41 = vector.shape_cast %40 : vector<1x128x128xbf16> to vector<128x128xbf16>
    %cst_19 = arith.constant dense<0.000000e+00> : vector<64x128xf32>
    %42 = tpu.matmul %39, %41, %cst_19 {dimension_numbers = #tpu.dot_dimension_numbers<[1], [0], [0], [1], [0, 0, 1, 1], [], []>} : vector<64x128xbf16>, vector<128x128xbf16>, vector<64x128xf32> -> vector<64x128xf32>
    %43 = arith.addf %33, %42 : vector<64x128xf32>
    %c8 = arith.constant 8 : index
    %c0_20 = arith.constant 0 : index
    %44 = vector.load %arg7[%c8, %c0_20] : memref<96x128xf32, #tpu.memory_space<vmem>>, vector<64x128xf32>
    %45 = arith.truncf %44 : vector<64x128xf32> to vector<64x128xbf16>
    %c1 = arith.constant 1 : index
    %c0_21 = arith.constant 0 : index
    %c0_22 = arith.constant 0 : index
    %46 = vector.load %arg4[%c1, %c0_21, %c0_22] : memref<9x128x128xbf16, #tpu.memory_space<vmem>>, vector<1x128x128xbf16>
    %47 = vector.shape_cast %46 : vector<1x128x128xbf16> to vector<128x128xbf16>
    %cst_23 = arith.constant dense<0.000000e+00> : vector<64x128xf32>
    %48 = tpu.matmul %45, %47, %cst_23 {dimension_numbers = #tpu.dot_dimension_numbers<[1], [0], [0], [1], [0, 0, 1, 1], [], []>} : vector<64x128xbf16>, vector<128x128xbf16>, vector<64x128xf32> -> vector<64x128xf32>
    %49 = arith.addf %43, %48 : vector<64x128xf32>
    %c9 = arith.constant 9 : index
    %c0_24 = arith.constant 0 : index
    %50 = vector.load %arg7[%c9, %c0_24] : memref<96x128xf32, #tpu.memory_space<vmem>>, vector<64x128xf32>
    %cst_25 = arith.constant 0.000000e+00 : f32
    %51 = vector.broadcast %cst_25 : f32 to vector<64x128xf32>
    %52 = vector.shape_cast %32 : vector<64x1xi1> to vector<64x1xi1>
    %53 = vector.broadcast %52 : vector<64x1xi1> to vector<64x128xi1>
    %54 = arith.select %53, %50, %51 : vector<64x128xi1>, vector<64x128xf32>
    %55 = arith.truncf %54 : vector<64x128xf32> to vector<64x128xbf16>
    %c2 = arith.constant 2 : index
    %c0_26 = arith.constant 0 : index
    %c0_27 = arith.constant 0 : index
    %56 = vector.load %arg4[%c2, %c0_26, %c0_27] : memref<9x128x128xbf16, #tpu.memory_space<vmem>>, vector<1x128x128xbf16>
    %57 = vector.shape_cast %56 : vector<1x128x128xbf16> to vector<128x128xbf16>
    %cst_28 = arith.constant dense<0.000000e+00> : vector<64x128xf32>
    %58 = tpu.matmul %55, %57, %cst_28 {dimension_numbers = #tpu.dot_dimension_numbers<[1], [0], [0], [1], [0, 0, 1, 1], [], []>} : vector<64x128xbf16>, vector<128x128xbf16>, vector<64x128xf32> -> vector<64x128xf32>
    %59 = arith.addf %49, %58 : vector<64x128xf32>
    %c15 = arith.constant 15 : index
    %c0_29 = arith.constant 0 : index
    %60 = vector.load %arg7[%c15, %c0_29] : memref<96x128xf32, #tpu.memory_space<vmem>>, vector<64x128xf32>
    %cst_30 = arith.constant 0.000000e+00 : f32
    %61 = vector.broadcast %cst_30 : f32 to vector<64x128xf32>
    %62 = vector.shape_cast %30 : vector<64x1xi1> to vector<64x1xi1>
    %63 = vector.broadcast %62 : vector<64x1xi1> to vector<64x128xi1>
    %64 = arith.select %63, %60, %61 : vector<64x128xi1>, vector<64x128xf32>
    %65 = arith.truncf %64 : vector<64x128xf32> to vector<64x128xbf16>
    %c3 = arith.constant 3 : index
    %c0_31 = arith.constant 0 : index
    %c0_32 = arith.constant 0 : index
    %66 = vector.load %arg4[%c3, %c0_31, %c0_32] : memref<9x128x128xbf16, #tpu.memory_space<vmem>>, vector<1x128x128xbf16>
    %67 = vector.shape_cast %66 : vector<1x128x128xbf16> to vector<128x128xbf16>
    %cst_33 = arith.constant dense<0.000000e+00> : vector<64x128xf32>
    %68 = tpu.matmul %65, %67, %cst_33 {dimension_numbers = #tpu.dot_dimension_numbers<[1], [0], [0], [1], [0, 0, 1, 1], [], []>} : vector<64x128xbf16>, vector<128x128xbf16>, vector<64x128xf32> -> vector<64x128xf32>
    %69 = arith.addf %59, %68 : vector<64x128xf32>
    %c16_34 = arith.constant 16 : index
    %c0_35 = arith.constant 0 : index
    %70 = vector.load %arg7[%c16_34, %c0_35] : memref<96x128xf32, #tpu.memory_space<vmem>>, vector<64x128xf32>
    %71 = arith.truncf %70 : vector<64x128xf32> to vector<64x128xbf16>
    %c4 = arith.constant 4 : index
    %c0_36 = arith.constant 0 : index
    %c0_37 = arith.constant 0 : index
    %72 = vector.load %arg4[%c4, %c0_36, %c0_37] : memref<9x128x128xbf16, #tpu.memory_space<vmem>>, vector<1x128x128xbf16>
    %73 = vector.shape_cast %72 : vector<1x128x128xbf16> to vector<128x128xbf16>
    %cst_38 = arith.constant dense<0.000000e+00> : vector<64x128xf32>
    %74 = tpu.matmul %71, %73, %cst_38 {dimension_numbers = #tpu.dot_dimension_numbers<[1], [0], [0], [1], [0, 0, 1, 1], [], []>} : vector<64x128xbf16>, vector<128x128xbf16>, vector<64x128xf32> -> vector<64x128xf32>
    %75 = arith.addf %69, %74 : vector<64x128xf32>
    %c17 = arith.constant 17 : index
    %c0_39 = arith.constant 0 : index
    %76 = vector.load %arg7[%c17, %c0_39] : memref<96x128xf32, #tpu.memory_space<vmem>>, vector<64x128xf32>
    %cst_40 = arith.constant 0.000000e+00 : f32
    %77 = vector.broadcast %cst_40 : f32 to vector<64x128xf32>
    %78 = vector.shape_cast %32 : vector<64x1xi1> to vector<64x1xi1>
    %79 = vector.broadcast %78 : vector<64x1xi1> to vector<64x128xi1>
    %80 = arith.select %79, %76, %77 : vector<64x128xi1>, vector<64x128xf32>
    %81 = arith.truncf %80 : vector<64x128xf32> to vector<64x128xbf16>
    %c5 = arith.constant 5 : index
    %c0_41 = arith.constant 0 : index
    %c0_42 = arith.constant 0 : index
    %82 = vector.load %arg4[%c5, %c0_41, %c0_42] : memref<9x128x128xbf16, #tpu.memory_space<vmem>>, vector<1x128x128xbf16>
    %83 = vector.shape_cast %82 : vector<1x128x128xbf16> to vector<128x128xbf16>
    %cst_43 = arith.constant dense<0.000000e+00> : vector<64x128xf32>
    %84 = tpu.matmul %81, %83, %cst_43 {dimension_numbers = #tpu.dot_dimension_numbers<[1], [0], [0], [1], [0, 0, 1, 1], [], []>} : vector<64x128xbf16>, vector<128x128xbf16>, vector<64x128xf32> -> vector<64x128xf32>
    %85 = arith.addf %75, %84 : vector<64x128xf32>
    %c23 = arith.constant 23 : index
    %c0_44 = arith.constant 0 : index
    %86 = vector.load %arg7[%c23, %c0_44] : memref<96x128xf32, #tpu.memory_space<vmem>>, vector<64x128xf32>
    %cst_45 = arith.constant 0.000000e+00 : f32
    %87 = vector.broadcast %cst_45 : f32 to vector<64x128xf32>
    %88 = vector.shape_cast %30 : vector<64x1xi1> to vector<64x1xi1>
    %89 = vector.broadcast %88 : vector<64x1xi1> to vector<64x128xi1>
    %90 = arith.select %89, %86, %87 : vector<64x128xi1>, vector<64x128xf32>
    %91 = arith.truncf %90 : vector<64x128xf32> to vector<64x128xbf16>
    %c6 = arith.constant 6 : index
    %c0_46 = arith.constant 0 : index
    %c0_47 = arith.constant 0 : index
    %92 = vector.load %arg4[%c6, %c0_46, %c0_47] : memref<9x128x128xbf16, #tpu.memory_space<vmem>>, vector<1x128x128xbf16>
    %93 = vector.shape_cast %92 : vector<1x128x128xbf16> to vector<128x128xbf16>
    %cst_48 = arith.constant dense<0.000000e+00> : vector<64x128xf32>
    %94 = tpu.matmul %91, %93, %cst_48 {dimension_numbers = #tpu.dot_dimension_numbers<[1], [0], [0], [1], [0, 0, 1, 1], [], []>} : vector<64x128xbf16>, vector<128x128xbf16>, vector<64x128xf32> -> vector<64x128xf32>
    %95 = arith.addf %85, %94 : vector<64x128xf32>
    %c24 = arith.constant 24 : index
    %c0_49 = arith.constant 0 : index
    %96 = vector.load %arg7[%c24, %c0_49] : memref<96x128xf32, #tpu.memory_space<vmem>>, vector<64x128xf32>
    %97 = arith.truncf %96 : vector<64x128xf32> to vector<64x128xbf16>
    %c7_50 = arith.constant 7 : index
    %c0_51 = arith.constant 0 : index
    %c0_52 = arith.constant 0 : index
    %98 = vector.load %arg4[%c7_50, %c0_51, %c0_52] : memref<9x128x128xbf16, #tpu.memory_space<vmem>>, vector<1x128x128xbf16>
    %99 = vector.shape_cast %98 : vector<1x128x128xbf16> to vector<128x128xbf16>
    %cst_53 = arith.constant dense<0.000000e+00> : vector<64x128xf32>
    %100 = tpu.matmul %97, %99, %cst_53 {dimension_numbers = #tpu.dot_dimension_numbers<[1], [0], [0], [1], [0, 0, 1, 1], [], []>} : vector<64x128xbf16>, vector<128x128xbf16>, vector<64x128xf32> -> vector<64x128xf32>
    %101 = arith.addf %95, %100 : vector<64x128xf32>
    %c25 = arith.constant 25 : index
    %c0_54 = arith.constant 0 : index
    %102 = vector.load %arg7[%c25, %c0_54] : memref<96x128xf32, #tpu.memory_space<vmem>>, vector<64x128xf32>
    %cst_55 = arith.constant 0.000000e+00 : f32
    %103 = vector.broadcast %cst_55 : f32 to vector<64x128xf32>
    %104 = vector.shape_cast %32 : vector<64x1xi1> to vector<64x1xi1>
    %105 = vector.broadcast %104 : vector<64x1xi1> to vector<64x128xi1>
    %106 = arith.select %105, %102, %103 : vector<64x128xi1>, vector<64x128xf32>
    %107 = arith.truncf %106 : vector<64x128xf32> to vector<64x128xbf16>
    %c8_56 = arith.constant 8 : index
    %c0_57 = arith.constant 0 : index
    %c0_58 = arith.constant 0 : index
    %108 = vector.load %arg4[%c8_56, %c0_57, %c0_58] : memref<9x128x128xbf16, #tpu.memory_space<vmem>>, vector<1x128x128xbf16>
    %109 = vector.shape_cast %108 : vector<1x128x128xbf16> to vector<128x128xbf16>
    %cst_59 = arith.constant dense<0.000000e+00> : vector<64x128xf32>
    %110 = tpu.matmul %107, %109, %cst_59 {dimension_numbers = #tpu.dot_dimension_numbers<[1], [0], [0], [1], [0, 0, 1, 1], [], []>} : vector<64x128xbf16>, vector<128x128xbf16>, vector<64x128xf32> -> vector<64x128xf32>
    %111 = arith.addf %101, %110 : vector<64x128xf32>
    %c0_60 = arith.constant 0 : index
    %c0_61 = arith.constant 0 : index
    %112 = vector.load %arg5[%c0_60, %c0_61] : memref<64x128xf32, #tpu.memory_space<vmem>>, vector<64x128xf32>
    tpu.vector_store %arg5[%c0_60, %c0_61], %111 {strides = array<i32>} : memref<64x128xf32, #tpu.memory_space<vmem>>, vector<64x128xf32>,
    %cst_62 = arith.constant dense<0.000000e+00> : vector<128xf32>
    %113 = vector.multi_reduction <add>, %111, %cst_62 [0] : vector<64x128xf32> to vector<128xf32>
    %114 = vector.shape_cast %113 : vector<128xf32> to vector<1x128xf32>
    %cst_63 = arith.constant 1.562500e-02 : f32
    %115 = vector.broadcast %cst_63 : f32 to vector<1x128xf32>
    %116 = arith.mulf %114, %115 : vector<1x128xf32>
    %117 = vector.broadcast %116 : vector<1x128xf32> to vector<64x128xf32>
    %118 = arith.subf %111, %117 : vector<64x128xf32>
    %119 = arith.mulf %118, %118 : vector<64x128xf32>
    %cst_64 = arith.constant dense<0.000000e+00> : vector<128xf32>
    %120 = vector.multi_reduction <add>, %119, %cst_64 [0] : vector<64x128xf32> to vector<128xf32>
    %121 = vector.shape_cast %120 : vector<128xf32> to vector<1x128xf32>
    %cst_65 = arith.constant 0.000000e+00 : f32
    %122 = vector.broadcast %cst_65 : f32 to vector<6x128xf32>
    %123 = tpu.concatenate %114, %121, %122 in 0 : vector<1x128xf32>, vector<1x128xf32>, vector<6x128xf32> -> vector<8x128xf32>
    %c0_66 = arith.constant 0 : index
    %c0_67 = arith.constant 0 : index
    %124 = vector.load %arg6[%c0_66, %c0_67] : memref<8x128xf32, #tpu.memory_space<vmem>>, vector<8x128xf32>
    tpu.vector_store %arg6[%c0_66, %c0_67], %123 {strides = array<i32>} : memref<8x128xf32, #tpu.memory_space<vmem>>, vector<8x128xf32>,
    return
  }
  func.func @transform_0(%arg0: i32) -> (i32, i32) {
    %c0_i32 = arith.constant 0 : i32
    %c0_i32_0 = arith.constant 0 : i32
    return %arg0, %c0_i32 : i32, i32
  }
  func.func @transform_1(%arg0: i32) -> (i32, i32) {
    %c0_i32 = arith.constant 0 : i32
    %c0_i32_0 = arith.constant 0 : i32
    %c0_i32_1 = arith.constant 0 : i32
    return %c0_i32, %c0_i32_0 : i32, i32
  }
  func.func @transform_2(%arg0: i32) -> (i32, i32) {
    %c0_i32 = arith.constant 0 : i32
    %c0_i32_0 = arith.constant 0 : i32
    %c0_i32_1 = arith.constant 0 : i32
    return %c0_i32, %c0_i32_0 : i32, i32
  }
  func.func @transform_3(%arg0: i32) -> (i32, i32, i32) {
    %c0_i32 = arith.constant 0 : i32
    %c0_i32_0 = arith.constant 0 : i32
    %c0_i32_1 = arith.constant 0 : i32
    %c0_i32_2 = arith.constant 0 : i32
    return %c0_i32, %c0_i32_0, %c0_i32_1 : i32, i32, i32
  }
  func.func @transform_4(%arg0: i32) -> (i32, i32) {
    %c0_i32 = arith.constant 0 : i32
    %c0_i32_0 = arith.constant 0 : i32
    return %arg0, %c0_i32 : i32, i32
  }
  func.func @transform_5(%arg0: i32) -> (i32, i32) {
    %c0_i32 = arith.constant 0 : i32
    %c0_i32_0 = arith.constant 0 : i32
    return %arg0, %c0_i32 : i32, i32
  }
}

module attributes {stable_mosaic.version = 11 : i64} {
  func.func @_bn_relu_kernel(%arg0: i32, %arg1: memref<64x128xf32, #tpu.memory_space<vmem>>, %arg2: memref<1x128xf32, #tpu.memory_space<vmem>>, %arg3: memref<1x128xf32, #tpu.memory_space<vmem>>, %arg4: memref<64x128xf32, #tpu.memory_space<vmem>>) attributes {dimension_semantics = [#tpu.dimension_semantics<parallel>], iteration_bounds = array<i64: 2>, scalar_prefetch = 0 : i64, scratch_operands = 0 : i64, tpu.core_type = #tpu.core_type<tc>, window_params = [{transform_indices = @transform_0, window_bounds = array<i64: 64, 128>}, {pipeline_mode = #tpu.pipeline_mode<synchronous>, transform_indices = @transform_1, window_bounds = array<i64: 1, 128>}, {pipeline_mode = #tpu.pipeline_mode<synchronous>, transform_indices = @transform_2, window_bounds = array<i64: 1, 128>}, {transform_indices = @transform_3, window_bounds = array<i64: 64, 128>}]} {
    %c0 = arith.constant 0 : index
    %c0_0 = arith.constant 0 : index
    %0 = vector.load %arg1[%c0, %c0_0] : memref<64x128xf32, #tpu.memory_space<vmem>>, vector<64x128xf32>
    %c0_1 = arith.constant 0 : index
    %c0_2 = arith.constant 0 : index
    %1 = vector.load %arg2[%c0_1, %c0_2] : memref<1x128xf32, #tpu.memory_space<vmem>>, vector<1x128xf32>
    %2 = vector.broadcast %1 : vector<1x128xf32> to vector<64x128xf32>
    %3 = arith.mulf %0, %2 : vector<64x128xf32>
    %c0_3 = arith.constant 0 : index
    %c0_4 = arith.constant 0 : index
    %4 = vector.load %arg3[%c0_3, %c0_4] : memref<1x128xf32, #tpu.memory_space<vmem>>, vector<1x128xf32>
    %5 = vector.broadcast %4 : vector<1x128xf32> to vector<64x128xf32>
    %6 = arith.addf %3, %5 : vector<64x128xf32>
    %cst = arith.constant 0.000000e+00 : f32
    %7 = vector.broadcast %cst : f32 to vector<64x128xf32>
    %8 = arith.maximumf %6, %7 : vector<64x128xf32>
    %c0_5 = arith.constant 0 : index
    %c0_6 = arith.constant 0 : index
    %9 = vector.load %arg4[%c0_5, %c0_6] : memref<64x128xf32, #tpu.memory_space<vmem>>, vector<64x128xf32>
    tpu.vector_store %arg4[%c0_5, %c0_6], %8 {strides = array<i32>} : memref<64x128xf32, #tpu.memory_space<vmem>>, vector<64x128xf32>,
    return
  }
  func.func @transform_0(%arg0: i32) -> (i32, i32) {
    %c0_i32 = arith.constant 0 : i32
    %c0_i32_0 = arith.constant 0 : i32
    return %arg0, %c0_i32 : i32, i32
  }
  func.func @transform_1(%arg0: i32) -> (i32, i32) {
    %c0_i32 = arith.constant 0 : i32
    %c0_i32_0 = arith.constant 0 : i32
    %c0_i32_1 = arith.constant 0 : i32
    return %c0_i32, %c0_i32_0 : i32, i32
  }
  func.func @transform_2(%arg0: i32) -> (i32, i32) {
    %c0_i32 = arith.constant 0 : i32
    %c0_i32_0 = arith.constant 0 : i32
    %c0_i32_1 = arith.constant 0 : i32
    return %c0_i32, %c0_i32_0 : i32, i32
  }
  func.func @transform_3(%arg0: i32) -> (i32, i32) {
    %c0_i32 = arith.constant 0 : i32
    %c0_i32_0 = arith.constant 0 : i32
    return %arg0, %c0_i32 : i32, i32
  }
}

</mosaic_0001>

<bundles_post_ra>
// kernel: down_forward.5
= control target key start
LH: loop header
LB: loop body
LE: loop exit
PB: predicated region body
PF: predicated region fallthrough
CT: control target
= control target key end

     0   :  { %s333_s12 = smov 0   ;;  %s356_s0 = inlined_call_operand.vmem [shape: f32[128,128], index: 0, kind: input, shape index: {}]   ;;  %s357_s1 = inlined_call_operand.vmem [shape: f32[1,128], index: 1, kind: input, shape index: {}]   ;;  %s358_s2 = inlined_call_operand.vmem [shape: f32[1,128], index: 2, kind: input, shape index: {}]   ;;  %s359_s3 = inlined_call_operand.vmem [shape: f32[128,128], index: 3, kind: output, shape index: {}]  }
   0x1 LB: > { %s284_s13 = sadd.s32 4294967295, %s311_s12   ;;  %p288_p0 = scmp.ge.s32.totalorder %s311_s12, 1  ;;  %s311_s12 = sphi %s333_s12, %s13_s12  }
   0x2   : > { %p138_p1 = scmp.lt.s32.totalorder %s311_s12, 3 }
   0x4   : > { %p139_p2 = pnand %p288_p0, %p138_p1 }
   0x5   : > { %s289_s14 = sshll.u32 (!%p139_p2), %s284_s13, 3 }
   0x6   : > { %142 = sbr.rel (%p139_p2) target bundleno = 25 (0x19), region = 32  ;;  %p163_p3 = scmp.lt.s32.totalorder (!%p139_p2), %s289_s14, 15 }
   0xb   : > { %s361_s14 = smov (!%p163_p3, %s289_s14), 15  ;;  %v293_v0 = vld [vmem:[%s357_s1] ss:$0 sm:$0xff] }
   0xc   : > { %s290_s15 = sshll.u32 %s361_s14, 3  ;;  %v294_v1 = vld [vmem:[%s358_s2] ss:$0 sm:$0xff] }
   0xd   : > { %s166_s20 = scalar_lea.vmem %s356_s0, %s290_s15  ;;  %s172_s25 = scalar_lea.vmem %s359_s3, %s290_s15 }
   0xe   : > { %v174_v2 = vld [vmem:[%s166_s20] sm:$0xff]  ;;  %v175_v3 = vld [vmem:[%s166_s20 + $0x8] sm:$0xff]  ;;  %v176_v4 = vld [vmem:[%s166_s20 + $0x10] sm:$0xff] }
   0xf   : > { %v189_v5 = vmul.f32 %v293_v0, %v174_v2  ;;  %v190_v6 = vmul.f32 %v293_v0, %v175_v3  ;;  %v191_v7 = vmul.f32 %v293_v0, %v176_v4  ;;  %v177_v8 = vld [vmem:[%s166_s20 + $0x18] sm:$0xff]  ;;  %v178_v9 = vld [vmem:[%s166_s20 + $0x20] sm:$0xff]  ;;  %v179_v10 = vld [vmem:[%s166_s20 + $0x28] sm:$0xff] }
  0x10   : > { %v192_v11 = vmul.f32 %v293_v0, %v177_v8  ;;  %v193_v12 = vmul.f32 %v293_v0, %v178_v9  ;;  %v194_v13 = vmul.f32 %v293_v0, %v179_v10  ;;  %v180_v14 = vld [vmem:[%s166_s20 + $0x30] sm:$0xff]  ;;  %v181_v15 = vld [vmem:[%s166_s20 + $0x38] sm:$0xff] }
  0x11   : > { %v204_v16 = vadd.f32 %v294_v1, %v189_v5  ;;  %v205_v17 = vadd.f32 %v294_v1, %v190_v6  ;;  %v206_v18 = vadd.f32 %v294_v1, %v191_v7  ;;  %v195_v19 = vmul.f32 %v293_v0, %v180_v14 }
  0x12   : > { %v207_v20 = vadd.f32 %v294_v1, %v192_v11  ;;  %v208_v21 = vadd.f32 %v294_v1, %v193_v12  ;;  %v209_v22 = vadd.f32 %v294_v1, %v194_v13  ;;  %v196_v23 = vmul.f32 %v293_v0, %v181_v15 }
  0x13   : > { %v212_v24 = vmax.f32 %v204_v16, 0.0  ;;  %v213_v25 = vmax.f32 %v205_v17, 0.0  ;;  %v214_v26 = vmax.f32 %v206_v18, 0.0  ;;  %v210_v27 = vadd.f32 %v294_v1, %v195_v19 }
  0x14   : > { %v215_v28 = vmax.f32 %v207_v20, 0.0  ;;  %v216_v29 = vmax.f32 %v208_v21, 0.0  ;;  %v217_v30 = vmax.f32 %v209_v22, 0.0  ;;  %v211_v31 = vadd.f32 %v294_v1, %v196_v23 }
  0x15   : > { %220 = vst [vmem:[%s172_s25] sm:$0xff] %v212_v24  ;;  %221 = vst [vmem:[%s172_s25 + $0x8] sm:$0xff] %v213_v25  ;;  %v218_v32 = vmax.f32 %v210_v27, 0.0 }
  0x16   : > { %222 = vst [vmem:[%s172_s25 + $0x10] sm:$0xff] %v214_v26  ;;  %223 = vst [vmem:[%s172_s25 + $0x18] sm:$0xff] %v215_v28  ;;  %v219_v33 = vmax.f32 %v211_v31, 0.0 }
  0x17   : > { %224 = vst [vmem:[%s172_s25 + $0x20] sm:$0xff] %v216_v29  ;;  %225 = vst [vmem:[%s172_s25 + $0x28] sm:$0xff] %v217_v30 }
  0x18   : > { %226 = vst [vmem:[%s172_s25 + $0x30] sm:$0xff] %v218_v32  ;;  %227 = vst [vmem:[%s172_s25 + $0x38] sm:$0xff] %v219_v33 }
  0x19 PF: > { %s13_s12 = sadd.s32 1, %s311_s12  }
  0x1a   : > { %p10_p4 = scmp.ge.s32.totalorder %s13_s12, 4  }
  0x1c   :  { %12 = sbr.rel (!%p10_p4) target bundleno = 1 (0x1), region = 62 }

// kernel: down_forward.3
= control target key start
LH: loop header
LB: loop body
LE: loop exit
PB: predicated region body
PF: predicated region fallthrough
CT: control target
= control target key end

     0   :  { %s2753_s12 = smov 0   ;;  %s3470_s0 = inlined_call_operand.vmem [shape: bf16[16,2,8,8], index: 0, kind: input, shape index: {}]   ;;  %s3471_s1 = inlined_call_operand.vmem [shape: bf16[9,128,128], index: 1, kind: input, shape index: {}]   ;;  %s3472_s2 = inlined_call_operand.vmem [shape: f32[128,128], index: 2, kind: output, shape index: {0}]   ;;  %s3473_s3 = inlined_call_operand.vmem [shape: f32[16,128], index: 3, kind: output, shape index: {1}]  }
   0x1 LB: > { %s2759_s13 = sadd.s32 4294967295, %s2728_s12   ;;  %p1971_p0 = scmp.ge.s32.totalorder %s2728_s12, 1  ;;  %s2728_s12 = sphi %s2753_s12, %s14_s12  }
   0x2   : > { %p142_p1 = scmp.lt.s32.totalorder %s2728_s12, 3 }
   0x4   : > { %p143_p2 = pnand %p1971_p0, %p142_p1 }
   0x6   : > { %146 = sbr.rel (%p143_p2) target bundleno = 537 (0x219), region = 28 }
   0xb   : > { %s1972_s14 = sshll.u32 %s2759_s13, 3  ;;  %v2603_v0 = vld [vmem:[%s3471_s1 + $0x78] sm:$0xff]   ;;  %v2605_v2 = vld [vmem:[%s3471_s1 + $0x70] sm:$0xff]   ;;  %v2730_v3 = vmov 0.0   ;;  %v2607_v5 = vld [vmem:[%s3471_s1 + $0x68] sm:$0xff]   ;;  %s2731_s4 = smov 124   ;;  %v290_v43 = vlaneseq }
   0xc   : > { %p172_p3 = scmp.lt.s32.totalorder %s1972_s14, 15  ;;  %v2604_v1 = vld [vmem:[%s3471_s1 + $0x38] sm:$0xff]   ;;  %2361 = vmatprep.subr.bf16.mxu0 %v2603_v0  ;;  %189 = vst [vmem:[#allocation2] sm:$0xff] %v2730_v3  ;;  %190 = vst [vmem:[#allocation2 + $0x8] sm:$0xff] %v2730_v3  ;;  %v2606_v4 = vld [vmem:[%s3471_s1 + $0x30] sm:$0xff]   ;;  %vm273_vm0 = vcmask 31744  }
   0xd   : > { %199 = vst [vmem:[#allocation2 + $0x50] sm:$0xff] %v2730_v3  ;;  %200 = vst [vmem:[#allocation2 + $0x58] sm:$0xff] %v2730_v3  ;;  %2385 = vmatprep.subr.bf16.mxu1 %v2604_v1  ;;  %2362 = vmatpush3.bf16.msra.mxu0 %v2603_v0  ;;  %v2608_v6 = vld [vmem:[%s3471_s1 + $0x28] sm:$0xff]   ;;  %v2609_v23 = vld [vmem:[%s3471_s1 + $0x60] sm:$0xff]   ;;  %v2886_v44 = vshrl.u32 %v290_v43, 7  ;;  %vm2732_vm1 = vmmov 1  }
   0xe   : > { %s3531_s14 = smov (!%p172_p3, %s1972_s14), 15  ;;  %2386 = vmatpush3.bf16.msra.mxu1 %v2604_v1  ;;  %2363 = vmatprep.subr.bf16.mxu0 %v2605_v2  ;;  %v2610_v26 = vld [vmem:[%s3471_s1 + $0x20] sm:$0xff]   ;;  %v2611_v29 = vld [vmem:[%s3471_s1 + $0x58] sm:$0xff]   ;;  %v2613_v33 = vld [vmem:[%s3471_s1 + $0x50] sm:$0xff]   ;;  %p184_p4 = scmp.lt.s32.totalorder %s2759_s13, 1 }
   0xf   : > { %s2252_s23 = sshll.u32 %s3531_s14, 3  ;;  %2387 = vmatprep.subr.bf16.mxu1 %v2606_v4  ;;  %v2612_v31 = vld [vmem:[%s3471_s1 + $0x18] sm:$0xff]   ;;  %v2614_v35 = vld [vmem:[%s3471_s1 + $0x10] sm:$0xff]   ;;  %v2615_v37 = vld [vmem:[%s3471_s1 + $0x48] sm:$0xff]   ;;  %v2896_v50 = vadd.s32 8, %v2886_v44  ;;  %v2900_v53 = vadd.s32 16, %v2886_v44 }
  0x10   : > { %s2791_s28 = scalar_lea.vmem %s3470_s0, %s2252_s23  ;;  %v2616_v38 = vld [vmem:[%s3471_s1 + $0x8] sm:$0xff]   ;;  %v2617_v39 = vld [vmem:[%s3471_s1 + $0x40] sm:$0xff]   ;;  %v2877_v41 = vld [vmem:[%s3471_s1 + $0xb8] sm:$0xff]   ;;  %v2907_v57 = vadd.s32 24, %v2886_v44  ;;  %v303_v61 = vand.u32 7, %v2886_v44  ;;  %s3533_s13 = smov (!%p184_p4, %s2759_s13), 1 }
  0x11   : > { %v205_v7 = vld [vmem:[%s2791_s28 + $0x10] sm:$0xf]  ;;  %v206_v8 = vld [vmem:[%s2791_s28 + $0x14] sm:$0xf]  ;;  %v201_v9 = vld [vmem:[%s2791_s28] sm:$0xf]  ;;  %2364 = vmatpush3.bf16.msra.mxu0 %v2605_v2 }
  0x12   : > { %v2799_v10 = vmax.bf16 %v206_v8, %v205_v7  ;;  %v202_v11 = vld [vmem:[%s2791_s28 + $0x4] sm:$0xf]  ;;  %v207_v12 = vld [vmem:[%s2791_s28 + $0x18] sm:$0xf]  ;;  %v208_v13 = vld [vmem:[%s2791_s28 + $0x1c] sm:$0xf]  ;;  %2388 = vmatpush3.bf16.msra.mxu1 %v2606_v4  ;;  %2365 = vmatprep.subr.bf16.mxu0 %v2607_v5 }
  0x13   : > { %v2804_v14 = vmax.bf16 %v202_v11, %v201_v9  ;;  %v203_v15 = vld [vmem:[%s2791_s28 + $0x8] sm:$0xf]  ;;  %v204_v16 = vld [vmem:[%s2791_s28 + $0xc] sm:$0xf]  ;;  %v2810_v17 = vmax.bf16 %v208_v13, %v207_v12  ;;  %2389 = vmatprep.subr.bf16.mxu1 %v2608_v6  ;;  %v209_v19 = vld [vmem:[%s2791_s28 + $0x20] sm:$0xf] }
  0x14   : > { %237 = vrot.lane.b32.xlu1 %v2799_v10, %s2731_s4  ;;  %v2814_v18 = vmax.bf16 %v204_v16, %v203_v15  ;;  %v211_v20 = vld [vmem:[%s2791_s28 + $0x28] sm:$0xf]  ;;  %v212_v21 = vld [vmem:[%s2791_s28 + $0x2c] sm:$0xf]  ;;  %v210_v22 = vld [vmem:[%s2791_s28 + $0x24] sm:$0xf] }
  0x15   : > { %233 = vrot.lane.b32.xlu0 %v2804_v14, %s2731_s4  ;;  %2366 = vmatpush3.bf16.msra.mxu0 %v2607_v5  ;;  %v215_v24 = vld [vmem:[%s2791_s28 + $0x38] sm:$0xf]  ;;  %v216_v25 = vld [vmem:[%s2791_s28 + $0x3c] sm:$0xf]  ;;  %v2830_v27 = vmax.bf16 %v212_v21, %v211_v20  ;;  %v213_v28 = vld [vmem:[%s2791_s28 + $0x30] sm:$0xf]  ;;  %v2838_v30 = vmax.bf16 %v210_v22, %v209_v19 }
  0x16   : > { %2390 = vmatpush3.bf16.msra.mxu1 %v2608_v6  ;;  %2367 = vmatprep.subr.bf16.mxu0 %v2609_v23  ;;  %v214_v32 = vld [vmem:[%s2791_s28 + $0x34] sm:$0xf]  ;;  %v2849_v34 = vmax.bf16 %v216_v25, %v215_v24  ;;  %v2618_v40 = vld [vmem:[%s3471_s1] sm:$0xff]   ;;  %v2882_v42 = vld [vmem:[%s3471_s1 + $0xf8] sm:$0xff]   ;;  %v310_v62 = vand.u32 7, %v2896_v50  ;;  %v317_v1 = vand.u32 7, %v2900_v53  ;;  %s3447_s28 = scalar_lea.vmem %s3472_s2, %s2252_s23 }
  0x17   : > { %2391 = vmatprep.subr.bf16.mxu1 %v2610_v26  ;;  %v2856_v36 = vmax.bf16 %v214_v32, %v213_v28  ;;  %vm2676_vm2 = vmpackc.low %vm273_vm0, %vm2732_vm1  ;;  %v324_v7 = vand.u32 7, %v2907_v57  ;;  %v2927_v8 = vadd.s32 32, %v2886_v44  ;;  %v2934_v11 = vadd.s32 40, %v2886_v44  ;;  %v411_v16 = vld [vmem:[#allocation2 + $0x7] sm:$0xff]  ;;  %v2638_v43 = vld [vmem:[%s3471_s1 + $0x170] sm:$0xff]   ;;  %s1977_s14 = sshll.u32 %s3533_s13, 3 }
  0x18   : > { %239 = vrot.lane.b32.xlu1 %v2810_v17, %s2731_s4  ;;  %vm2937_vm3 = vcmp.ge.s32.totalorder %v303_v61, 1  ;;  %vm2941_vm4 = vcmp.ge.s32.totalorder %v310_v62, 1  ;;  %vm2951_vm5 = vcmp.ge.s32.totalorder %v317_v1, 1  ;;  %vm2958_vm6 = vmpackc.low %vm273_vm0, %vm273_vm0  ;;  %vm3033_vm11 = vcmp.le.s32.totalorder %v303_v61, 6  ;;  %v2634_v57 = vld [vmem:[%s3471_s1 + $0xc0] sm:$0xff]   ;;  %v2672_v61 = vld [vmem:[%s3471_s1 + $0x210] sm:$0xff]   ;;  %s187_s30 = scalar_lea.vmem %s3473_s3, %s1977_s14 }
  0x19   : > { %235 = vrot.lane.b32.xlu0 %v2814_v18, %s2731_s4  ;;  %2368 = vmatpush3.bf16.msra.mxu0 %v2609_v23  ;;  %vm2971_vm7 = vcmp.ge.s32.totalorder %v324_v7, 1  ;;  %v331_v24 = vand.u32 7, %v2927_v8  ;;  %vm2989_vm8 = vmpackc.low %vm2941_vm4, %vm2937_vm3  ;;  %vm3037_vm12 = vcmp.le.s32.totalorder %v310_v62, 6  ;;  %v2625_v62 = vld [vmem:[%s3471_s1 + $0xa0] sm:$0xff]  }
  0x1a   : > { %2392 = vmatpush3.bf16.msra.mxu1 %v2610_v26  ;;  %2369 = vmatprep.subr.bf16.mxu0 %v2611_v29  ;;  %vm3013_vm9 = vmpackc.low %vm2971_vm7, %vm2951_vm5  ;;  %v2633_v23 = vld [vmem:[%s3471_s1 + $0x80] sm:$0xff]   ;;  %vm405_vm5 = vcmp.le.s32.totalorder %v317_v1, 6  ;;  %vm406_vm7 = vcmp.le.s32.totalorder %v324_v7, 6 }
  0x1b   : > { %2393 = vmatprep.subr.bf16.mxu1 %v2612_v31  ;;  %vm3019_vm10 = vcmp.ge.s32.totalorder %v331_v24, 1  ;;  %vm3065_vm14 = vmpackc.low %vm3037_vm12, %vm3033_vm11 }
  0x1c   : > { %243 = vrot.lane.b32.xlu1 %v2830_v27, %s2731_s4  ;;  %vm3171_vm12 = vmpackc.low %vm406_vm7, %vm405_vm5 }
  0x1d   : > { %241 = vrot.lane.b32.xlu0 %v2838_v30, %s2731_s4  ;;  %2370 = vmatpush3.bf16.msra.mxu0 %v2611_v29  ;;  %v2661_v29 = vld [vmem:[%s3471_s1 + $0x190] sm:$0xff]  }
  0x1e   : > { %2394 = vmatpush3.bf16.msra.mxu1 %v2612_v31  ;;  %2371 = vmatprep.subr.bf16.mxu0 %v2613_v33  ;;  %v2996_v31 = vadd.s32 48, %v2886_v44 }
  0x1f   : > { %2395 = vmatprep.subr.bf16.mxu1 %v2614_v35 }
  0x20   : > { %247 = vrot.lane.b32.xlu1 %v2849_v34, %s2731_s4 }
  0x21   : > { %245 = vrot.lane.b32.xlu0 %v2856_v36, %s2731_s4  ;;  %2372 = vmatpush3.bf16.msra.mxu0 %v2613_v33  ;;  %v2623_v33 = vld [vmem:[%s3471_s1 + $0xa8] sm:$0xff]  }
  0x22   : > { %2396 = vmatpush3.bf16.msra.mxu1 %v2614_v35  ;;  %2373 = vmatprep.subr.bf16.mxu0 %v2615_v37  ;;  %v3004_v35 = vadd.s32 56, %v2886_v44 }
  0x23   : > { %2397 = vmatprep.subr.bf16.mxu1 %v2616_v38 }
  0x25   : > { %2374 = vmatpush3.bf16.msra.mxu0 %v2615_v37 }
  0x26   : > { %2398 = vmatpush3.bf16.msra.mxu1 %v2616_v38  ;;  %2375 = vmatprep.subr.bf16.mxu0 %v2617_v39  ;;  %v2639_v38 = vld [vmem:[%s3471_s1 + $0x128] sm:$0xff]  }
  0x27   : > { %2399 = vmatprep.subr.bf16.mxu1 %v2618_v40 }
  0x29   : > { %2376 = vmatpush3.bf16.msra.mxu0 %v2617_v39 }
  0x2a   : > { %2400 = vmatpush3.bf16.msra.mxu1 %v2618_v40  ;;  %2409 = vmatprep.subr.bf16.mxu0 %v2877_v41 }
  0x2b   : > { %2433 = vmatprep.subr.bf16.mxu1 %v2882_v42 }
  0x86   : > { %v238_v45 = vpop.permute.xlu1 %237 }
  0x87   : > { %v2889_v46 = vmax.bf16 %v238_v45, %v2799_v10  ;;  %v234_v47 = vpop.permute.xlu0 %233 }
  0x88   : > { %v2892_v48 = vmax.bf16 %v234_v47, %v2804_v14  ;;  %v2621_v14 = vld [vmem:[%s3471_s1 + $0xb0] sm:$0xff]  }
  0x89   : > { %v267_v49 = vunpack.c.l.bf16 %v2889_v46 }
  0x8a   : > { %v265_v51 = vunpack.c.l.bf16 %v2892_v48  ;;  %v240_v52 = vpop.permute.xlu1 %239 }
  0x8b   : > { %v276_v54 = vsel %vm273_vm0, %v267_v49, 0.0  ;;  %v2904_v55 = vmax.bf16 %v240_v52, %v2810_v17  ;;  %v236_v56 = vpop.permute.xlu0 %235  ;;  %v2629_v17 = vld [vmem:[%s3471_s1 + $0x90] sm:$0xff]  }
  0x8c   : > { %284 = vst [vmem:[#allocation2 + $0x20] sm:$0xff] %v276_v54  ;;  %v274_v58 = vsel %vm273_vm0, %v265_v51, 0.0  ;;  %v2911_v59 = vmax.bf16 %v236_v56, %v2814_v18  ;;  %v2677_v6 = vpack.c.bf16 %v265_v51, %v2730_v3  ;;  %v345_v51 = vand.u32 7, %v2996_v31  ;;  %v2622_v56 = vld [vmem:[%s3471_s1 + $0xf0] sm:$0xff]  }
  0x8d   : > { %282 = vst [vmem:[#allocation2 + $0x10] sm:$0xff] %v274_v58  ;;  %v268_v60 = vunpack.c.l.bf16 %v2904_v55  ;;  %v352_v58 = vand.u32 7, %v3004_v35 }
  0x8e   : > { %v266_v63 = vunpack.c.l.bf16 %v2911_v59  ;;  %v244_v0 = vpop.permute.xlu1 %243  ;;  %2678 = vmatprep.mubr.msk.bf16.mxu0 %vm2676_vm2, %v2677_v6  ;;  %v2964_v22 = vcombine.low %v2911_v59, %v2889_v46  ;;  %vm401_vm2 = vcmp.ge.s32.totalorder %v345_v51, 1 }
  0x8f   : > { %v277_v2 = vsel %vm273_vm0, %v268_v60, 0.0  ;;  %v242_v4 = vpop.permute.xlu0 %241  ;;  %v2920_v5 = vmax.bf16 %v244_v0, %v2830_v27  ;;  %vm402_vm3 = vcmp.ge.s32.totalorder %v352_v58, 1 }
  0x90   : > { %285 = vst [vmem:[#allocation2 + $0x28] sm:$0xff] %v277_v2  ;;  %v275_v9 = vsel %vm273_vm0, %v266_v63, 0.0  ;;  %v2931_v10 = vmax.bf16 %v242_v4, %v2838_v30  ;;  %2681 = vmatmul.mubr.msk.bf16.vlgmr.msra.gmra.mxu0 %vm2958_vm6, %v2964_v22  ;;  %v338_v30 = vand.u32 7, %v2934_v11  ;;  %vm3118_vm4 = vmpackc.low %vm402_vm3, %vm401_vm2  ;;  %vm409_vm2 = vcmp.le.s32.totalorder %v345_v51, 6  ;;  %v2670_v4 = vld [vmem:[%s3471_s1 + $0x220] sm:$0xff]  }
  0x91   : > { %283 = vst [vmem:[#allocation2 + $0x18] sm:$0xff] %v275_v9  ;;  %v270_v12 = vunpack.c.l.bf16 %v2920_v5  ;;  %2410 = vmatpush3.bf16.msra.mxu0 %v2877_v41  ;;  %v2627_v9 = vld [vmem:[%s3471_s1 + $0x98] sm:$0xff]   ;;  %vm410_vm3 = vcmp.le.s32.totalorder %v352_v58, 6  ;;  %v2719_v51 = vcombine.low %v2892_v48, %v2911_v59  ;;  %v2645_v48 = vld [vmem:[%s3471_s1 + $0x110] sm:$0xff]  }
  0x92   : > { %v269_v15 = vunpack.c.l.bf16 %v2931_v10  ;;  %v248_v18 = vpop.permute.xlu1 %247  ;;  %2411 = vmatprep.subr.bf16.mxu0 %v2621_v14  ;;  %v3025_v39 = vcombine.low %v2904_v55, %v2931_v10  ;;  %vm3046_vm13 = vcmp.ge.s32.totalorder %v338_v30, 1  ;;  %vm408_vm11 = vcmp.le.s32.totalorder %v338_v30, 6  ;;  %v2637_v30 = vld [vmem:[%s3471_s1 + $0x130] sm:$0xff]   ;;  %vm3218_vm5 = vmpackc.low %vm410_vm3, %vm409_vm2  ;;  %v2644_v59 = vld [vmem:[%s3471_s1 + $0x158] sm:$0xff]  }
  0x93   : > { %v279_v19 = vsel %vm273_vm0, %v270_v12, 0.0  ;;  %v246_v20 = vpop.permute.xlu0 %245  ;;  %v2977_v25 = vmax.bf16 %v248_v18, %v2849_v34  ;;  %vm3091_vm15 = vmpackc.low %vm3046_vm13, %vm3019_vm10  ;;  %v2628_v18 = vld [vmem:[%s3471_s1 + $0xd8] sm:$0xff]   ;;  %vm407_vm10 = vcmp.le.s32.totalorder %v331_v24, 6 }
  0x94   : > { %v278_v26 = vsel %vm273_vm0, %v269_v15, 0.0  ;;  %287 = vst [vmem:[#allocation2 + $0x38] sm:$0xff] %v279_v19  ;;  %v2981_v27 = vmax.bf16 %v246_v20, %v2856_v36  ;;  %v2983_v28 = vld [vmem:[#allocation2 + $0xf] sm:$0xff]  ;;  %2684 = vmatprep.mubr.msk.bf16.mxu0 %vm2958_vm6, %v3025_v39  ;;  %v2626_v15 = vld [vmem:[%s3471_s1 + $0xe0] sm:$0xff]   ;;  %vm3180_vm13 = vmpackc.low %vm408_vm11, %vm407_vm10 }
  0x95   : > { %286 = vst [vmem:[#allocation2 + $0x30] sm:$0xff] %v278_v26  ;;  %v2011_v32 = vpack.c.bf16 %v2983_v28, %v411_v16  ;;  %v272_v34 = vunpack.c.l.bf16 %v2977_v25  ;;  %v718_v44 = vld [vmem:[#allocation2 + $0x9] sm:$0xff]  ;;  %2412 = vmatpush3.bf16.msra.mxu0 %v2621_v14 }
  0x96   : > { %v271_v36 = vunpack.c.l.bf16 %v2981_v27  ;;  %2413 = vmatprep.subr.bf16.mxu0 %v2623_v33  ;;  %v3077_v63 = vcombine.low %v2920_v5, %v2981_v27  ;;  %v2631_v19 = vld [vmem:[%s3471_s1 + $0x88] sm:$0xff]   ;;  %v2630_v20 = vld [vmem:[%s3471_s1 + $0xd0] sm:$0xff]  }
  0x97   : > { %2401 = vmatprep.mubr.msk.bf16.mxu1 %vm2989_vm8, %v2011_v32  ;;  %v281_v40 = vsel %vm273_vm0, %v272_v34, 0.0  ;;  %v3083_v0 = vld [vmem:[#allocation2 + $0x27] sm:$0xff] }
  0x98   : > { %v280_v45 = vsel %vm273_vm0, %v271_v36, 0.0  ;;  %v413_v47 = vld [vmem:[#allocation2 + $0x17] sm:$0xff]  ;;  %v3042_v49 = vld [vmem:[#allocation2 + $0x1f] sm:$0xff]  ;;  %289 = vst [vmem:[#allocation2 + $0x48] sm:$0xff] %v281_v40  ;;  %2687 = vmatmul.mubr.msk.bf16.gmra.mxu0 %vm2958_vm6, %v3077_v63  ;;  %v2632_v26 = vld [vmem:[%s3471_s1 + $0xc8] sm:$0xff]  }
  0x99   : > { %v3051_v52 = vld [vmem:[#allocation2 + $0x11] sm:$0xff]  ;;  %288 = vst [vmem:[#allocation2 + $0x40] sm:$0xff] %v280_v45  ;;  %v3054_v54 = vpack.c.bf16 %v3042_v49, %v413_v47  ;;  %2414 = vmatpush3.bf16.msra.mxu0 %v2623_v33  ;;  %v2083_v16 = vpack.c.bf16 %v413_v47, %v2983_v28  ;;  %v720_v32 = vld [vmem:[#allocation2 + $0x19] sm:$0xff]  ;;  %v3160_v33 = vld [vmem:[#allocation2 + $0x21] sm:$0xff]  ;;  %v2086_v41 = vpack.c.bf16 %v3083_v0, %v3042_v49 }
  0x9a   : > { %v2047_v60 = vpack.c.bf16 %v3051_v52, %v718_v44  ;;  %2415 = vmatprep.subr.bf16.mxu0 %v2625_v62  ;;  %v2635_v28 = vld [vmem:[%s3471_s1 + $0x138] sm:$0xff]   ;;  %v3176_v7 = vpack.c.bf16 %v3160_v33, %v720_v32  ;;  %v2641_v47 = vld [vmem:[%s3471_s1 + $0x120] sm:$0xff]   ;;  %v2640_v49 = vld [vmem:[%s3471_s1 + $0x168] sm:$0xff]  }
  0x9b   : > { %2402 = vmatmul.mubr.msk.bf16.vlgmr.msra.gmra.mxu1 %vm3013_vm9, %v3054_v54  ;;  %v2636_v36 = vld [vmem:[%s3471_s1 + $0x178] sm:$0xff]  }
  0x9c   : > { %2434 = vmatpush3.bf16.msra.mxu1 %v2882_v42  ;;  %v3085_v2 = vld [vmem:[#allocation2 + $0x2f] sm:$0xff]  ;;  %2425 = vmatprep.mubr.msk.bf16.mxu0 %vm3065_vm14, %v2047_v60  ;;  %v3111_v12 = vld [vmem:[#allocation2 + $0x37] sm:$0xff]  ;;  %v2642_v60 = vld [vmem:[%s3471_s1 + $0x160] sm:$0xff]  }
  0x9d   : > { %2435 = vmatprep.subr.bf16.mxu1 %v2622_v56  ;;  %v3097_v6 = vpack.c.bf16 %v3085_v2, %v3083_v0  ;;  %v2624_v42 = vld [vmem:[%s3471_s1 + $0xe8] sm:$0xff]   ;;  %2416 = vmatpush3.bf16.msra.mxu0 %v2625_v62  ;;  %v3166_v53 = vld [vmem:[#allocation2 + $0x31] sm:$0xff]  ;;  %v2089_v31 = vpack.c.bf16 %v3111_v12, %v3085_v2  ;;  %v2143_v62 = vpack.c.bf16 %v720_v32, %v3051_v52  ;;  %v2649_v2 = vld [vmem:[%s3471_s1 + $0x100] sm:$0xff]  }
  0x9e   : > { %2417 = vmatprep.subr.bf16.mxu0 %v2627_v9  ;;  %v3178_v8 = vld [vmem:[#allocation2 + $0x29] sm:$0xff] }
  0x9f   : > { %2405 = vmatprep.mubr.msk.bf16.mxu1 %vm3091_vm15, %v3097_v6  ;;  %v3186_v24 = vpack.c.bf16 %v3166_v53, %v3178_v8  ;;  %v2647_v52 = vld [vmem:[%s3471_s1 + $0x108] sm:$0xff]   ;;  %v2646_v0 = vld [vmem:[%s3471_s1 + $0x150] sm:$0xff]  }
  0xa0   : > { %2436 = vmatpush3.bf16.msra.mxu1 %v2622_v56  ;;  %v3116_v3 = vld [vmem:[#allocation2 + $0x3f] sm:$0xff]  ;;  %v3239_v50 = vld [vmem:[#allocation2 + $0x47] sm:$0xff] }
  0xa1   : > { %2437 = vmatprep.subr.bf16.mxu1 %v2624_v42  ;;  %v3124_v14 = vpack.c.bf16 %v3116_v3, %v3111_v12  ;;  %2418 = vmatpush3.bf16.msra.mxu0 %v2627_v9  ;;  %v3207_v40 = vld [vmem:[#allocation2 + $0x41] sm:$0xff]  ;;  %v3216_v35 = vld [vmem:[#allocation2 + $0x39] sm:$0xff]  ;;  %v2092_v58 = vpack.c.bf16 %v3239_v50, %v3116_v3  ;;  %v2653_v3 = vld [vmem:[%s3471_s1 + $0x1b0] sm:$0xff]  }
  0xa2   : > { %2419 = vmatprep.subr.bf16.mxu0 %v2629_v17  ;;  %v3226_v45 = vpack.c.bf16 %v3207_v40, %v3216_v35  ;;  %v2643_v56 = vld [vmem:[%s3471_s1 + $0x118] sm:$0xff]   ;;  %v2650_v12 = vld [vmem:[%s3471_s1 + $0x140] sm:$0xff]   ;;  %v2663_v32 = vld [vmem:[%s3471_s1 + $0x188] sm:$0xff]  }
  0xa3   : > { %2406 = vmatmul.mubr.msk.bf16.gmra.mxu1 %vm3118_vm4, %v3124_v14  ;;  %v2651_v9 = vld [vmem:[%s3471_s1 + $0x1b8] sm:$0xff]  }
  0xa4   : > { %2438 = vmatpush3.bf16.msra.mxu1 %v2624_v42  ;;  %2449 = vmatprep.mubr.msk.bf16.mxu1 %vm2989_vm8, %v2083_v16  ;;  %v2648_v42 = vld [vmem:[%s3471_s1 + $0x148] sm:$0xff]   ;;  %v2652_v16 = vld [vmem:[%s3471_s1 + $0x1f8] sm:$0xff]  }
  0xa5   : > { %2439 = vmatprep.subr.bf16.mxu1 %v2626_v15  ;;  %2420 = vmatpush3.bf16.msra.mxu0 %v2629_v17  ;;  %v2721_v17 = vcombine.low %v2931_v10, %v2920_v5  ;;  %v2149_v5 = vpack.c.bf16 %v3216_v35, %v3166_v53  ;;  %v2657_v10 = vld [vmem:[%s3471_s1 + $0x1a0] sm:$0xff]   ;;  %v2664_v53 = vld [vmem:[%s3471_s1 + $0x1c8] sm:$0xff]  }
  0xa6   : > { %2421 = vmatprep.subr.bf16.mxu0 %v2631_v19 }
  0xa8   : > { %2440 = vmatpush3.bf16.msra.mxu1 %v2626_v15  ;;  %v2720_v15 = vcombine.low %v2889_v46, %v2904_v55  ;;  %v2146_v46 = vpack.c.bf16 %v3178_v8, %v3160_v33  ;;  %v2654_v55 = vld [vmem:[%s3471_s1 + $0x1f0] sm:$0xff]   ;;  %v2666_v8 = vld [vmem:[%s3471_s1 + $0x1c0] sm:$0xff]  }
  0xa9   : > { %2441 = vmatprep.subr.bf16.mxu1 %v2628_v18  ;;  %2422 = vmatpush3.bf16.msra.mxu0 %v2631_v19  ;;  %v2722_v19 = vcombine.low %v2981_v27, %v2977_v25  ;;  %v2662_v33 = vld [vmem:[%s3471_s1 + $0x1d0] sm:$0xff]   ;;  %v2674_v25 = vld [vmem:[%s3471_s1 + $0x200] sm:$0xff]  }
  0xaa   : > { %2423 = vmatprep.subr.bf16.mxu0 %v2633_v23 }
  0xac   : > { %2442 = vmatpush3.bf16.msra.mxu1 %v2628_v18  ;;  %v2655_v18 = vld [vmem:[%s3471_s1 + $0x1a8] sm:$0xff]  }
  0xad   : > { %2443 = vmatprep.subr.bf16.mxu1 %v2630_v20  ;;  %2424 = vmatpush3.bf16.msra.mxu0 %v2633_v23  ;;  %v3320_v23 = vld [vmem:[#allocation2 + $0x49] sm:$0xff] }
  0xae   : > { %2457 = vmatprep.subr.bf16.mxu0 %v2635_v28  ;;  %v2152_v27 = vpack.c.bf16 %v3320_v23, %v3207_v40 }
  0xb0   : > { %2444 = vmatpush3.bf16.msra.mxu1 %v2630_v20  ;;  %2426 = vmatmul.mubr.msk.bf16.vlgmr.msra.gmra.mxu0 %vm3171_vm12, %v3176_v7  ;;  %v2656_v20 = vld [vmem:[%s3471_s1 + $0x1e8] sm:$0xff]  }
  0xb1   : > { %2445 = vmatprep.subr.bf16.mxu1 %v2632_v26  ;;  %2429 = vmatprep.mubr.msk.bf16.mxu0 %vm3180_vm13, %v3186_v24 }
  0xb2   : > { %2458 = vmatpush3.bf16.msra.mxu0 %v2635_v28  ;;  %v2658_v28 = vld [vmem:[%s3471_s1 + $0x1e0] sm:$0xff]  }
  0xb3   : > { %2459 = vmatprep.subr.bf16.mxu0 %v2637_v30 }
  0xb4   : > { %2446 = vmatpush3.bf16.msra.mxu1 %v2632_v26  ;;  %v2659_v26 = vld [vmem:[%s3471_s1 + $0x198] sm:$0xff]  }
  0xb5   : > { %2447 = vmatprep.subr.bf16.mxu1 %v2634_v57 }
  0xb6   : > { %2460 = vmatpush3.bf16.msra.mxu0 %v2637_v30  ;;  %v2668_v30 = vld [vmem:[%s3471_s1 + $0x230] sm:$0xff]  }
  0xb7   : > { %2461 = vmatprep.subr.bf16.mxu0 %v2639_v38 }
  0xb8   : > { %2448 = vmatpush3.bf16.msra.mxu1 %v2634_v57  ;;  %2430 = vmatmul.mubr.msk.bf16.gmra.mxu0 %vm3218_vm5, %v3226_v45  ;;  %v2667_v57 = vld [vmem:[%s3471_s1 + $0x238] sm:$0xff]  }
  0xb9   : > { %2481 = vmatprep.subr.bf16.mxu1 %v2636_v36  ;;  %2690 = vmatprep.mubr.msk.bf16.mxu0 %vm2958_vm6, %v2719_v51 }
  0xba   : > { %2462 = vmatpush3.bf16.msra.mxu0 %v2639_v38  ;;  %v1365_v38 = vld [vmem:[#allocation2 + $0x4f] sm:$0xff] }
  0xbb   : > { %2450 = vmatmul.mubr.msk.bf16.vlgmr.msra.gmra.mxu1 %vm3013_vm9, %v2086_v41  ;;  %2463 = vmatprep.subr.bf16.mxu0 %v2641_v47  ;;  %v2188_v37 = vpack.c.bf16 %v1365_v38, %v3239_v50 }
  0xbc   : > { %2453 = vmatprep.mubr.msk.bf16.mxu1 %vm3091_vm15, %v2089_v31  ;;  %2482 = vmatpush3.bf16.msra.mxu1 %v2636_v36  ;;  %v2669_v36 = vld [vmem:[%s3471_s1 + $0x228] sm:$0xff]  }
  0xbd   : > { %2483 = vmatprep.subr.bf16.mxu1 %v2638_v43 }
  0xbe   : > { %2464 = vmatpush3.bf16.msra.mxu0 %v2641_v47 }
  0xbf   : > { %2465 = vmatprep.subr.bf16.mxu0 %v2643_v56 }
  0xc0   : > { %2484 = vmatpush3.bf16.msra.mxu1 %v2638_v43 }
  0xc1   : > { %2485 = vmatprep.subr.bf16.mxu1 %v2640_v49 }
  0xc2   : > { %2466 = vmatpush3.bf16.msra.mxu0 %v2643_v56 }
  0xc3   : > { %2454 = vmatmul.mubr.msk.bf16.gmra.mxu1 %vm3118_vm4, %v2092_v58  ;;  %2467 = vmatprep.subr.bf16.mxu0 %v2645_v48 }
  0xc4   : > { %2486 = vmatpush3.bf16.msra.mxu1 %v2640_v49  ;;  %2497 = vmatprep.mubr.msk.bf16.mxu1 %vm3065_vm14, %v2143_v62 }
  0xc5   : > { %2487 = vmatprep.subr.bf16.mxu1 %v2642_v60 }
  0xc6   : > { %2468 = vmatpush3.bf16.msra.mxu0 %v2645_v48 }
  0xc7   : > { %2469 = vmatprep.subr.bf16.mxu0 %v2647_v52 }
  0xc8   : > { %2488 = vmatpush3.bf16.msra.mxu1 %v2642_v60 }
  0xc9   : > { %2489 = vmatprep.subr.bf16.mxu1 %v2644_v59 }
  0xca   : > { %2470 = vmatpush3.bf16.msra.mxu0 %v2647_v52 }
  0xcb   : > { %2471 = vmatprep.subr.bf16.mxu0 %v2649_v2 }
  0xcc   : > { %2490 = vmatpush3.bf16.msra.mxu1 %v2644_v59 }
  0xcd   : > { %2491 = vmatprep.subr.bf16.mxu1 %v2646_v0 }
  0xce   : > { %2472 = vmatpush3.bf16.msra.mxu0 %v2649_v2 }
  0xcf   : > { %2505 = vmatprep.subr.bf16.mxu0 %v2651_v9 }
  0xd0   : > { %2492 = vmatpush3.bf16.msra.mxu1 %v2646_v0 }
  0xd1   : > { %2493 = vmatprep.subr.bf16.mxu1 %v2648_v42  ;;  %2693 = vmatmul.mubr.msk.bf16.vlgmr.msra.gmra.mxu0 %vm2958_vm6, %v2720_v15 }
  0xd2   : > { %2696 = vmatprep.mubr.msk.bf16.mxu0 %vm2958_vm6, %v2721_v17  ;;  %2506 = vmatpush3.bf16.msra.mxu0 %v2651_v9 }
  0xd3   : > { %2507 = vmatprep.subr.bf16.mxu0 %v2653_v3 }
  0xd4   : > { %2494 = vmatpush3.bf16.msra.mxu1 %v2648_v42 }
  0xd5   : > { %2495 = vmatprep.subr.bf16.mxu1 %v2650_v12 }
  0xd6   : > { %2508 = vmatpush3.bf16.msra.mxu0 %v2653_v3 }
  0xd7   : > { %2509 = vmatprep.subr.bf16.mxu0 %v2655_v18 }
  0xd8   : > { %2496 = vmatpush3.bf16.msra.mxu1 %v2650_v12 }
  0xd9   : > { %2529 = vmatprep.subr.bf16.mxu1 %v2652_v16  ;;  %2699 = vmatmul.mubr.msk.bf16.gmra.mxu0 %vm2958_vm6, %v2722_v19 }
  0xda   : > { %2510 = vmatpush3.bf16.msra.mxu0 %v2655_v18  ;;  %2521 = vmatprep.mubr.msk.bf16.mxu0 %vm2989_vm8, %v3054_v54  ;;  %v2660_v54 = vld [vmem:[%s3471_s1 + $0x1d8] sm:$0xff]  }
  0xdb   : > { %2498 = vmatmul.mubr.msk.bf16.vlgmr.msra.gmra.mxu1 %vm3171_vm12, %v2146_v46  ;;  %2511 = vmatprep.subr.bf16.mxu0 %v2657_v10 }
  0xdc   : > { %2501 = vmatprep.mubr.msk.bf16.mxu1 %vm3180_vm13, %v2149_v5  ;;  %2530 = vmatpush3.bf16.msra.mxu1 %v2652_v16 }
  0xdd   : > { %2531 = vmatprep.subr.bf16.mxu1 %v2654_v55 }
  0xde   : > { %2512 = vmatpush3.bf16.msra.mxu0 %v2657_v10 }
  0xdf   : > { %2513 = vmatprep.subr.bf16.mxu0 %v2659_v26 }
  0xe0   : > { %2532 = vmatpush3.bf16.msra.mxu1 %v2654_v55 }
  0xe1   : > { %2533 = vmatprep.subr.bf16.mxu1 %v2656_v20 }
  0xe2   : > { %2514 = vmatpush3.bf16.msra.mxu0 %v2659_v26 }
  0xe3   : > { %2502 = vmatmul.mubr.msk.bf16.gmra.mxu1 %vm3218_vm5, %v2152_v27  ;;  %2515 = vmatprep.subr.bf16.mxu0 %v2661_v29 }
  0xe4   : > { %2534 = vmatpush3.bf16.msra.mxu1 %v2656_v20  ;;  %2702 = vmatprep.mubr.msk.bf16.mxu1 %vm2958_vm6, %v2964_v22  ;;  %v2665_v22 = vld [vmem:[%s3471_s1 + $0x180] sm:$0xff]  }
  0xe5   : > { %2535 = vmatprep.subr.bf16.mxu1 %v2658_v28 }
  0xe6   : > { %2516 = vmatpush3.bf16.msra.mxu0 %v2661_v29 }
  0xe7   : > { %2517 = vmatprep.subr.bf16.mxu0 %v2663_v32 }
  0xe8   : > { %2536 = vmatpush3.bf16.msra.mxu1 %v2658_v28 }
  0xe9   : > { %2537 = vmatprep.subr.bf16.mxu1 %v2660_v54 }
  0xea   : > { %2518 = vmatpush3.bf16.msra.mxu0 %v2663_v32 }
  0xeb   : > { %2519 = vmatprep.subr.bf16.mxu0 %v2665_v22 }
  0xec   : > { %2538 = vmatpush3.bf16.msra.mxu1 %v2660_v54 }
  0xed   : > { %2539 = vmatprep.subr.bf16.mxu1 %v2662_v33 }
  0xee   : > { %2520 = vmatpush3.bf16.msra.mxu0 %v2665_v22 }
  0xef   : > { %2553 = vmatprep.subr.bf16.mxu0 %v2667_v57 }
  0xf0   : > { %2540 = vmatpush3.bf16.msra.mxu1 %v2662_v33 }
  0xf1   : > { %2541 = vmatprep.subr.bf16.mxu1 %v2664_v53  ;;  %2522 = vmatmul.mubr.msk.bf16.vlgmr.msra.gmra.mxu0 %vm3013_vm9, %v3097_v6  ;;  %v2675_v6 = vld [vmem:[#allocation2] sm:$0xff] }
  0xf2   : > { %2525 = vmatprep.mubr.msk.bf16.mxu0 %vm3091_vm15, %v3124_v14  ;;  %2554 = vmatpush3.bf16.msra.mxu0 %v2667_v57  ;;  %v2710_v21 = vpack.c.bf16 %v2675_v6, %v272_v34  ;;  %v1673_v34 = vld [vmem:[#allocation2 + $0x51] sm:$0xff] }
  0xf3   : > { %2555 = vmatprep.subr.bf16.mxu0 %v2668_v30  ;;  %v2248_v13 = vpack.c.bf16 %v1673_v34, %v3320_v23 }
  0xf4   : > { %2542 = vmatpush3.bf16.msra.mxu1 %v2664_v53 }
  0xf5   : > { %2543 = vmatprep.subr.bf16.mxu1 %v2666_v8 }
  0xf6   : > { %2556 = vmatpush3.bf16.msra.mxu0 %v2668_v30 }
  0xf7   : > { %2557 = vmatprep.subr.bf16.mxu0 %v2669_v36 }
  0xf8   : > { %2544 = vmatpush3.bf16.msra.mxu1 %v2666_v8 }
  0xf9   : > { %2577 = vmatprep.subr.bf16.mxu1 %v2667_v57  ;;  %2526 = vmatmul.mubr.msk.bf16.gmra.mxu0 %vm3118_vm4, %v2188_v37 }
  0xfa   : > { %2558 = vmatpush3.bf16.msra.mxu0 %v2669_v36  ;;  %2569 = vmatprep.mubr.msk.bf16.mxu0 %vm3065_vm14, %v3176_v7 }
  0xfb   : > { %2705 = vmatmul.mubr.msk.bf16.vlgmr.msra.gmra.mxu1 %vm2958_vm6, %v3025_v39  ;;  %2559 = vmatprep.subr.bf16.mxu0 %v2670_v4  ;;  %v2671_v39 = vld [vmem:[%s3471_s1 + $0x218] sm:$0xff]  }
  0xfc   : > { %2708 = vmatprep.mubr.msk.bf16.mxu1 %vm2958_vm6, %v3077_v63  ;;  %2585 = vmatpush3.bf16.msra.mxu1 %v2667_v57  ;;  %vm2709_vm6 = vmpackc.low %vm2732_vm1, %vm273_vm0  ;;  %v2673_v63 = vld [vmem:[%s3471_s1 + $0x208] sm:$0xff]   ;;  %vm1875_vm0 = vcmask 1040384   ;;  %vm1877_vm1 = vcmask 1041408  }
  0xfd   : > { %2578 = vmatprep.subr.bf16.mxu1 %v2668_v30 }
  0xfe   : > { %2560 = vmatpush3.bf16.msra.mxu0 %v2670_v4 }
  0xff   : > { %2561 = vmatprep.subr.bf16.mxu0 %v2671_v39 }
 0x100   : > { %2586 = vmatpush3.bf16.msra.mxu1 %v2668_v30 }
 0x101   : > { %2579 = vmatprep.subr.bf16.mxu1 %v2669_v36 }
 0x102   : > { %2562 = vmatpush3.bf16.msra.mxu0 %v2671_v39 }
 0x103   : > { %2711 = vmatmul.mubr.msk.bf16.gmra.mxu1 %vm2709_vm6, %v2710_v21  ;;  %2563 = vmatprep.subr.bf16.mxu0 %v2672_v61 }
 0x104   : > { %2587 = vmatpush3.bf16.msra.mxu1 %v2669_v36  ;;  %2573 = vmatprep.mubr.msk.bf16.mxu1 %vm3180_vm13, %v3226_v45 }
 0x105   : > { %2580 = vmatprep.subr.bf16.mxu1 %v2670_v4 }
 0x106   : > { %2564 = vmatpush3.bf16.msra.mxu0 %v2672_v61 }
 0x107   : > { %2565 = vmatprep.subr.bf16.mxu0 %v2673_v63 }
 0x108   : > { %2588 = vmatpush3.bf16.msra.mxu1 %v2670_v4 }
 0x109   : > { %2581 = vmatprep.subr.bf16.mxu1 %v2671_v39 }
 0x10a   : > { %2566 = vmatpush3.bf16.msra.mxu0 %v2673_v63 }
 0x10b   : > { %2567 = vmatprep.subr.bf16.mxu0 %v2674_v25 }
 0x10c   : > { %2589 = vmatpush3.bf16.msra.mxu1 %v2671_v39 }
 0x10d   : > { %2582 = vmatprep.subr.bf16.mxu1 %v2672_v61 }
 0x10e   : > { %2568 = vmatpush3.bf16.msra.mxu0 %v2674_v25 }
 0x110   : > { %2590 = vmatpush3.bf16.msra.mxu1 %v2672_v61 }
 0x111   : > { %2583 = vmatprep.subr.bf16.mxu1 %v2673_v63  ;;  %2570 = vmatmul.mubr.msk.bf16.vlgmr.msra.gmra.mxu0 %vm3171_vm12, %v3186_v24 }
 0x114   : > { %2591 = vmatpush3.bf16.msra.mxu1 %v2673_v63 }
 0x115   : > { %2584 = vmatprep.subr.bf16.mxu1 %v2674_v25 }
 0x118   : > { %2592 = vmatpush3.bf16.msra.mxu1 %v2674_v25 }
 0x11b   : > { %2574 = vmatmul.mubr.msk.bf16.vlgmr.msra.gmra.mxu1 %vm3218_vm5, %v2248_v13 }
 0x150   : > { %v2379_v14 = vpop.f32.mrf.mxu0 }
 0x152   : > { %v574_v7 = vpop.f32.mrf.mxu0 }
 0x154   : > { %v2380_v40 = vpop.f32.mrf.mxu0 }
 0x156   : > { %v577_v43 = vpop.f32.mrf.mxu0 }
 0x158   : > { %v2383_v35 = vpop.f32.mrf.mxu0 }
 0x15a   : > { %v590_v47 = vpop.f32.mrf.mxu0 }
 0x15b   : > { %v2403_v11 = vpop.f32.mrf.mxu1 }
 0x15c   : > { %v3414_v1 = vpop.f32.mrf.mxu0  ;;  %v696_v39 = vadd.f32 %v2403_v11, %v2379_v14 }
 0x15d   : > { %v687_v41 = vpop.f32.mrf.mxu1  ;;  %3508 = vst [vmem:[#allocation3_spill] sm:$0xff] %v3414_v1 }
 0x15e   : > { %v3416_v50 = vpop.f32.mrf.mxu0  ;;  %v688_v21 = vadd.f32 %v687_v41, %v574_v7 }
 0x15f   : > { %v2404_v31 = vpop.f32.mrf.mxu1  ;;  %3509 = vst [vmem:[#allocation4_spill] sm:$0xff] %v3416_v50 }
 0x160   : > { %v699_v25 = vadd.f32 %v2404_v31, %v2380_v40 }
 0x161   : > { %v690_v45 = vpop.f32.mrf.mxu1 }
 0x163   : > { %v2407_v49 = vpop.f32.mrf.mxu1 }
 0x164   : > { %v3519_v7 = vld [vmem:[#allocation3_spill] sm:$0xff] }
 0x165   : > { %v703_v24 = vpop.f32.mrf.mxu1 }
 0x167   : > { %v3418_v51 = vpop.f32.mrf.mxu1 }
 0x168   : > { %3510 = vst [vmem:[#allocation5_spill] sm:$0xff] %v3418_v51 }
 0x169   : > { %v3420_v56 = vpop.f32.mrf.mxu1 }
 0x16a   : > { %3511 = vst [vmem:[#allocation6_spill] sm:$0xff] %v3420_v56 }
 0x16f   : > { %v3520_v41 = vld [vmem:[#allocation5_spill] sm:$0xff] }
 0x170   : > { %v2427_v44 = vpop.f32.mrf.mxu0 }
 0x171   : > { %v886_v61 = vadd.f32 %v2427_v44, %v696_v39  ;;  %v715_v44 = vadd.f32 %v3520_v41, %v3519_v7 }
 0x172   : > { %v853_v58 = vpop.f32.mrf.mxu0 }
 0x173   : > { %v884_v13 = vadd.f32 %v853_v58, %v688_v21 }
 0x174   : > { %v2428_v62 = vpop.f32.mrf.mxu0 }
 0x176   : > { %v856_v59 = vpop.f32.mrf.mxu0 }
 0x178   : > { %v2431_v0 = vpop.f32.mrf.mxu0 }
 0x17a   : > { %v869_v42 = vpop.f32.mrf.mxu0 }
 0x17b   : > { %v2451_v60 = vpop.f32.mrf.mxu1 }
 0x17c   : > { %v2432_v12 = vpop.f32.mrf.mxu0  ;;  %v1044_v34 = vadd.f32 %v2451_v60, %v886_v61  ;;  %v3522_v60 = vld [vmem:[#allocation6_spill] sm:$0xff] }
 0x17d   : > { %v1011_v48 = vpop.f32.mrf.mxu1 }
 0x17e   : > { %v3422_v15 = vpop.f32.mrf.mxu0 }
 0x17f   : > { %v2452_v52 = vpop.f32.mrf.mxu1  ;;  %3512 = vst [vmem:[#allocation7_spill] sm:$0xff] %v3422_v15 }
 0x181   : > { %v1014_v2 = vpop.f32.mrf.mxu1 }
 0x183   : > { %v2455_v9 = vpop.f32.mrf.mxu1 }
 0x185   : > { %v1027_v3 = vpop.f32.mrf.mxu1 }
 0x187   : > { %v3424_v16 = vpop.f32.mrf.mxu1 }
 0x188   : > { %3513 = vst [vmem:[#allocation8_spill] sm:$0xff] %v3424_v16  ;;  %v704_v16 = vadd.f32 %v703_v24, %v590_v47 }
 0x189   : > { %v3426_v18 = vpop.f32.mrf.mxu1 }
 0x18a   : > { %3514 = vst [vmem:[#allocation9_spill] sm:$0xff] %v3426_v18  ;;  %v1042_v18 = vadd.f32 %v1011_v48, %v884_v13  ;;  %v888_v40 = vadd.f32 %v869_v42, %v704_v16 }
 0x18c   : > { %v1046_v24 = vadd.f32 %v1027_v3, %v888_v40 }
 0x191   : > { %v2475_v17 = vpop.f32.mrf.mxu0 }
 0x192   : > { %v1194_v15 = vadd.f32 %v2475_v17, %v1044_v34 }
 0x193   : > { %v1161_v46 = vpop.f32.mrf.mxu0 }
 0x194   : > { %v1192_v14 = vadd.f32 %v1161_v46, %v1042_v18  ;;  %v3523_v18 = vld [vmem:[#allocation8_spill] sm:$0xff] }
 0x195   : > { %v2476_v5 = vpop.f32.mrf.mxu0 }
 0x197   : > { %v1164_v19 = vpop.f32.mrf.mxu0 }
 0x199   : > { %v2479_v23 = vpop.f32.mrf.mxu0 }
 0x19b   : > { %v2499_v55 = vpop.f32.mrf.mxu1  ;;  %v1177_v27 = vpop.f32.mrf.mxu0 }
 0x19c   : > { %v1352_v11 = vadd.f32 %v2499_v55, %v1194_v15 }
 0x19d   : > { %v1319_v10 = vpop.f32.mrf.mxu1  ;;  %v3428_v29 = vpop.f32.mrf.mxu0 }
 0x19e   : > { %3515 = vst [vmem:[#allocation10_spill] sm:$0xff] %v3428_v29  ;;  %v712_v29 = vadd.f32 %v2407_v49, %v2383_v35  ;;  %v3521_v49 = vld [vmem:[#allocation4_spill] sm:$0xff] }
 0x19f   : > { %v2500_v20 = vpop.f32.mrf.mxu1  ;;  %v3430_v32 = vpop.f32.mrf.mxu0  ;;  %v707_v47 = vadd.f32 %v3522_v60, %v3521_v49 }
 0x1a0   : > { %3516 = vst [vmem:[#allocation11_spill] sm:$0xff] %v3430_v32  ;;  %v691_v32 = vadd.f32 %v690_v45, %v577_v43  ;;  %v890_v1 = vadd.f32 %v2431_v0, %v712_v29  ;;  %v1350_v43 = vadd.f32 %v1319_v10, %v1192_v14 }
 0x1a1   : > { %v1322_v26 = vpop.f32.mrf.mxu1 }
 0x1a2   : > { %v885_v56 = vadd.f32 %v856_v59, %v691_v32  ;;  %v1048_v58 = vadd.f32 %v2455_v9, %v890_v1  ;;  %v1196_v9 = vadd.f32 %v1177_v27, %v1046_v24 }
 0x1a3   : > { %v2503_v28 = vpop.f32.mrf.mxu1 }
 0x1a4   : > { %v1043_v39 = vadd.f32 %v1014_v2, %v885_v56  ;;  %v1198_v0 = vadd.f32 %v2479_v23, %v1048_v58  ;;  %v3524_v2 = vld [vmem:[#allocation7_spill] sm:$0xff] }
 0x1a5   : > { %v1335_v54 = vpop.f32.mrf.mxu1  ;;  %v889_v42 = vadd.f32 %v3524_v2, %v707_v47 }
 0x1a6   : > { %v1193_v48 = vadd.f32 %v1164_v19, %v1043_v39  ;;  %v1356_v3 = vadd.f32 %v2503_v28, %v1198_v0  ;;  %v1354_v19 = vadd.f32 %v1335_v54, %v1196_v9 }
 0x1a7   : > { %v3432_v33 = vpop.f32.mrf.mxu1 }
 0x1a8   : > { %3517 = vst [vmem:[#allocation12_spill] sm:$0xff] %v3432_v33  ;;  %v1351_v1 = vadd.f32 %v1322_v26, %v1193_v48 }
 0x1a9   : > { %v3434_v53 = vpop.f32.mrf.mxu1 }
 0x1aa   : > { %3518 = vst [vmem:[#allocation13_spill] sm:$0xff] %v3434_v53  ;;  %v887_v53 = vadd.f32 %v2428_v62, %v699_v25  ;;  %v891_v62 = vadd.f32 %v2432_v12, %v715_v44 }
 0x1ac   : > { %v1045_v51 = vadd.f32 %v2452_v52, %v887_v53  ;;  %v1049_v56 = vadd.f32 %v3523_v18, %v891_v62 }
 0x1ae   : > { %v1195_v45 = vadd.f32 %v2476_v5, %v1045_v51  ;;  %v3525_v5 = vld [vmem:[#allocation9_spill] sm:$0xff] }
 0x1af   : > { %v1047_v10 = vadd.f32 %v3525_v5, %v889_v42  ;;  %v3527_v53 = vld [vmem:[#allocation12_spill] sm:$0xff] }
 0x1b0   : > { %v1353_v52 = vadd.f32 %v2500_v20, %v1195_v45  ;;  %v3526_v20 = vld [vmem:[#allocation10_spill] sm:$0xff] }
 0x1b1   : > { %v2523_v22 = vpop.f32.mrf.mxu0  ;;  %v1199_v23 = vadd.f32 %v3526_v20, %v1049_v56  ;;  %v3529_v34 = vld [vmem:[#allocation13_spill] sm:$0xff] }
 0x1b2   : > { %v1510_v35 = vadd.f32 %v2523_v22, %v1352_v11 }
 0x1b3   : > { %v1477_v57 = vpop.f32.mrf.mxu0 }
 0x1b4   : > { %v1508_v17 = vadd.f32 %v1477_v57, %v1350_v43  ;;  %v1357_v57 = vadd.f32 %v3527_v53, %v1199_v23 }
 0x1b5   : > { %v2524_v30 = vpop.f32.mrf.mxu0 }
 0x1b6   : > { %v1511_v46 = vadd.f32 %v2524_v30, %v1353_v52 }
 0x1b7   : > { %v1480_v38 = vpop.f32.mrf.mxu0 }
 0x1b8   : > { %v1509_v29 = vadd.f32 %v1480_v38, %v1351_v1 }
 0x1b9   : > { %v2527_v4 = vpop.f32.mrf.mxu0 }
 0x1ba   : > { %v1514_v32 = vadd.f32 %v2527_v4, %v1356_v3 }
 0x1bb   : > { %v2547_v8 = vpop.f32.mrf.mxu1  ;;  %v1493_v63 = vpop.f32.mrf.mxu0 }
 0x1bc   : > { %v1660_v15 = vadd.f32 %v2547_v8, %v1510_v35  ;;  %v3528_v8 = vld [vmem:[#allocation11_spill] sm:$0xff]  ;;  %v1512_v25 = vadd.f32 %v1493_v63, %v1354_v19 }
 0x1bd   : > { %v1627_v36 = vpop.f32.mrf.mxu1  ;;  %v2528_v50 = vpop.f32.mrf.mxu0  ;;  %v1197_v28 = vadd.f32 %v3528_v8, %v1047_v10 }
 0x1be   : > { %v1658_v16 = vadd.f32 %v1627_v36, %v1508_v17  ;;  %v1515_v11 = vadd.f32 %v2528_v50, %v1357_v57 }
 0x1bf   : > { %v2548_v37 = vpop.f32.mrf.mxu1  ;;  %v1496_v59 = vpop.f32.mrf.mxu0 }
 0x1c0   : > { %v1661_v27 = vadd.f32 %v2548_v37, %v1511_v46  ;;  %v1355_v37 = vadd.f32 %v3529_v34, %v1197_v28 }
 0x1c1   : > { %v1630_v6 = vpop.f32.mrf.mxu1 }
 0x1c2   : > { %v1659_v21 = vadd.f32 %v1630_v6, %v1509_v29  ;;  %v1513_v44 = vadd.f32 %v1496_v59, %v1355_v37 }
 0x1c3   : > { %v2551_v33 = vpop.f32.mrf.mxu1 }
 0x1c4   : > { %v1664_v61 = vadd.f32 %v2551_v33, %v1514_v32 }
 0x1c5   : > { %v1643_v31 = vpop.f32.mrf.mxu1 }
 0x1c6   : > { %v1662_v13 = vadd.f32 %v1643_v31, %v1512_v25 }
 0x1c7   : > { %v2552_v51 = vpop.f32.mrf.mxu1 }
 0x1c8   : > { %v1665_v6 = vadd.f32 %v2552_v51, %v1515_v11 }
 0x1c9   : > { %v1646_v36 = vpop.f32.mrf.mxu1 }
 0x1ca   : > { %v1663_v40 = vadd.f32 %v1646_v36, %v1513_v44 }
 0x1d1   : > { %v2571_v12 = vpop.f32.mrf.mxu0 }
 0x1d2   : > { %v1818_v55 = vadd.f32 %v2571_v12, %v1660_v15 }
 0x1d3   : > { %v1785_v26 = vpop.f32.mrf.mxu0 }
 0x1d4   : > { %1826 = vst [vmem:[%s3447_s28 + $0x10] sm:$0xff] %v1818_v55  ;;  %v1816_v22 = vadd.f32 %v1785_v26, %v1658_v16 }
 0x1d5   : > { %v2572_v30 = vpop.f32.mrf.mxu0 }
 0x1d6   : > { %1824 = vst [vmem:[%s3447_s28] sm:$0xff] %v1816_v22  ;;  %v1819_v54 = vadd.f32 %v2572_v30, %v1661_v27 }
 0x1d7   : > { %v1788_v4 = vpop.f32.mrf.mxu0 }
 0x1d8   : > { %1827 = vst [vmem:[%s3447_s28 + $0x18] sm:$0xff] %v1819_v54  ;;  %v1817_v7 = vadd.f32 %v1788_v4, %v1659_v21 }
 0x1da   : > { %1825 = vst [vmem:[%s3447_s28 + $0x8] sm:$0xff] %v1817_v7  ;;  %v1832_v63 = vadd.f32 %v1817_v7, %v1816_v22 }
 0x1db   : > { %v2575_v38 = vpop.f32.mrf.mxu1 }
 0x1dc   : > { %v1822_v14 = vadd.f32 %v2575_v38, %v1664_v61  ;;  %v1833_v43 = vadd.f32 %v1832_v63, %v1818_v55 }
 0x1dd   : > { %v1801_v41 = vpop.f32.mrf.mxu1 }
 0x1de   : > { %1830 = vst [vmem:[%s3447_s28 + $0x30] sm:$0xff] %v1822_v14  ;;  %v1820_v33 = vadd.f32 %v1801_v41, %v1662_v13  ;;  %v1834_v31 = vadd.f32 %v1833_v43, %v1819_v54 }
 0x1df   : > { %v2576_v39 = vpop.f32.mrf.mxu1 }
 0x1e0   : > { %1828 = vst [vmem:[%s3447_s28 + $0x20] sm:$0xff] %v1820_v33  ;;  %v1823_v58 = vadd.f32 %v2576_v39, %v1665_v6  ;;  %v1835_v35 = vadd.f32 %v1834_v31, %v1820_v33 }
 0x1e1   : > { %v1804_v45 = vpop.f32.mrf.mxu1 }
 0x1e2   : > { %1831 = vst [vmem:[%s3447_s28 + $0x38] sm:$0xff] %v1823_v58  ;;  %v1821_v50 = vadd.f32 %v1804_v45, %v1663_v40 }
 0x1e4   : > { %1829 = vst [vmem:[%s3447_s28 + $0x28] sm:$0xff] %v1821_v50  ;;  %v1836_v49 = vadd.f32 %v1835_v35, %v1821_v50 }
 0x1e6   : > { %v1837_v60 = vadd.f32 %v1836_v49, %v1822_v14 }
 0x1e8   : > { %v1838_v47 = vadd.f32 %v1837_v60, %v1823_v58 }
 0x1ea   : > { %v1839_v24 = vrot.slane %v1838_v47, 4 }
 0x1ec   : > { %v1840_v62 = vadd.f32 %v1839_v24, %v1838_v47 }
 0x1ee   : > { %v1841_v48 = vrot.slane %v1840_v62, 2 }
 0x1f0   : > { %v1842_v59 = vadd.f32 %v1841_v48, %v1840_v62 }
 0x1f2   : > { %v1843_v52 = vrot.slane %v1842_v59, 1 }
 0x1f4   : > { %v1844_v0 = vadd.f32 %v1843_v52, %v1842_v59 }
 0x1f6   : > { %v1845_v15 = vmul.f32 0.015625, %v1844_v0 }
 0x1f8   : > { %v1846_v17 = vsub.f32 %v1816_v22, %v1845_v15  ;;  %v1847_v18 = vsub.f32 %v1817_v7, %v1845_v15  ;;  %v1848_v56 = vsub.f32 %v1818_v55, %v1845_v15  ;;  %v1849_v2 = vsub.f32 %v1819_v54, %v1845_v15 }
 0x1f9   : > { %v1850_v9 = vsub.f32 %v1820_v33, %v1845_v15  ;;  %v1851_v3 = vsub.f32 %v1821_v50, %v1845_v15  ;;  %v1852_v5 = vsub.f32 %v1822_v14, %v1845_v15  ;;  %v1853_v20 = vsub.f32 %v1823_v58, %v1845_v15 }
 0x1fa   : > { %v1854_v42 = vmul.f32 %v1846_v17, %v1846_v17  ;;  %v1855_v1 = vmul.f32 %v1847_v18, %v1847_v18  ;;  %v1856_v51 = vmul.f32 %v1848_v56, %v1848_v56  ;;  %v1857_v16 = vmul.f32 %v1849_v2, %v1849_v2 }
 0x1fb   : > { %v1858_v10 = vmul.f32 %v1850_v9, %v1850_v9  ;;  %v1859_v23 = vmul.f32 %v1851_v3, %v1851_v3  ;;  %v1860_v27 = vmul.f32 %v1852_v5, %v1852_v5  ;;  %v1861_v55 = vmul.f32 %v1853_v20, %v1853_v20 }
 0x1fc   : > { %v1862_v12 = vadd.f32 %v1855_v1, %v1854_v42 }
 0x1fe   : > { %v1863_v46 = vadd.f32 %v1862_v12, %v1856_v51 }
 0x200   : > { %v1864_v19 = vadd.f32 %v1863_v46, %v1857_v16 }
 0x202   : > { %v1865_v26 = vadd.f32 %v1864_v19, %v1858_v10 }
 0x204   : > { %v1866_v29 = vadd.f32 %v1865_v26, %v1859_v23 }
 0x206   : > { %v1867_v32 = vadd.f32 %v1866_v29, %v1860_v27 }
 0x208   : > { %v1868_v22 = vadd.f32 %v1867_v32, %v1861_v55 }
 0x20a   : > { %v1869_v53 = vrot.slane %v1868_v22, 4 }
 0x20c   : > { %v1870_v57 = vadd.f32 %v1869_v53, %v1868_v22 }
 0x20e   : > { %v1871_v8 = vrot.slane %v1870_v57, 2 }
 0x210   : > { %v1872_v28 = vadd.f32 %v1871_v8, %v1870_v57 }
 0x212   : > { %v1873_v36 = vrot.slane %v1872_v28, 1 }
 0x214   : > { %v1874_v30 = vadd.f32 %v1873_v36, %v1872_v28 }
 0x216   : > { %v1876_v21 = vsel %vm1875_vm0, %v1844_v0, %v1874_v30 }
 0x217   : > { %v1878_v61 = vsel %vm1877_vm1, %v1876_v21, 0.0 }
 0x218   : > { %1879 = vst [vmem:[%s187_s30] sm:$0xff] %v1878_v61 }
 0x219 PF: > { %s14_s12 = sadd.s32 1, %s2728_s12  }
 0x21a   : > { %p11_p5 = scmp.ge.s32.totalorder %s14_s12, 4  }
 0x21c   :  { %13 = sbr.rel (!%p11_p5) target bundleno = 1 (0x1), region = 78 }

// kernel: down_forward.4
= control target key start
LH: loop header
LB: loop body
LE: loop exit
PB: predicated region body
PF: predicated region fallthrough
CT: control target
= control target key end

     0   :  { %s2729_s18 = smov 0   ;;  %s3350_s0 = inlined_call_operand.vmem [shape: f32[128,128], index: 0, kind: input, shape index: {}]   ;;  %s3351_s1 = inlined_call_operand.vmem [shape: f32[1,128], index: 1, kind: input, shape index: {}]   ;;  %s3352_s2 = inlined_call_operand.vmem [shape: f32[1,128], index: 2, kind: input, shape index: {}]   ;;  %s3353_s3 = inlined_call_operand.vmem [shape: bf16[9,128,128], index: 3, kind: input, shape index: {}]   ;;  %s3354_s4 = inlined_call_operand.vmem [shape: f32[128,128], index: 4, kind: output, shape index: {0}]   ;;  %s3355_s5 = inlined_call_operand.vmem [shape: f32[16,128], index: 5, kind: output, shape index: {1}]  }
   0x1 LB: > { %s2735_s19 = sadd.s32 4294967295, %s2696_s18   ;;  %p1987_p0 = scmp.ge.s32.totalorder %s2696_s18, 1  ;;  %s2696_s18 = sphi %s2729_s18, %s16_s18  }
   0x2   : > { %p191_p1 = scmp.lt.s32.totalorder %s2696_s18, 3 }
   0x4   : > { %p192_p2 = pnand %p1987_p0, %p191_p1 }
   0x6   : > { %195 = sbr.rel (%p192_p2) target bundleno = 434 (0x1b2), region = 36 }
   0xb   : > { %v2618_v0 = vld [vmem:[%s3353_s3 + $0x78] sm:$0xff]   ;;  %s1988_s22 = sshll.u32 %s2735_s19, 3  ;;  %v2620_v2 = vld [vmem:[%s3353_s3 + $0x70] sm:$0xff]   ;;  %v2698_v4 = vmov 0.0   ;;  %v2622_v5 = vld [vmem:[%s3353_s3 + $0x68] sm:$0xff]   ;;  %v306_v7 = vlaneseq  ;;  %p235_p4 = scmp.lt.s32.totalorder %s2735_s19, 1 }
   0xc   : > { %v2619_v1 = vld [vmem:[%s3353_s3 + $0x38] sm:$0xff]   ;;  %p2746_p3 = scmp.lt.s32.totalorder %s1988_s22, 15  ;;  %2377 = vmatprep.subr.bf16.mxu0 %v2618_v0  ;;  %v2621_v3 = vld [vmem:[%s3353_s3 + $0x30] sm:$0xff]   ;;  %241 = vst [vmem:[#allocation2 + $0x8] sm:$0xff] %v2698_v4  ;;  %240 = vst [vmem:[#allocation2] sm:$0xff] %v2698_v4 }
   0xd   : > { %2401 = vmatprep.subr.bf16.mxu1 %v2619_v1  ;;  %2378 = vmatpush3.bf16.msra.mxu0 %v2618_v0  ;;  %250 = vst [vmem:[#allocation2 + $0x50] sm:$0xff] %v2698_v4  ;;  %251 = vst [vmem:[#allocation2 + $0x58] sm:$0xff] %v2698_v4  ;;  %v2623_v6 = vld [vmem:[%s3353_s3 + $0x28] sm:$0xff]   ;;  %v2624_v8 = vld [vmem:[%s3353_s3 + $0x60] sm:$0xff]   ;;  %v2777_v10 = vshrl.u32 %v306_v7, 7  ;;  %s3392_s19 = smov (!%p235_p4, %s2735_s19), 1 }
   0xe   : > { %2402 = vmatpush3.bf16.msra.mxu1 %v2619_v1  ;;  %2379 = vmatprep.subr.bf16.mxu0 %v2620_v2  ;;  %s3390_s22 = smov (!%p2746_p3, %s1988_s22), 15  ;;  %v2625_v9 = vld [vmem:[%s3353_s3 + $0x20] sm:$0xff]   ;;  %v2626_v11 = vld [vmem:[%s3353_s3 + $0x58] sm:$0xff]   ;;  %v2628_v13 = vld [vmem:[%s3353_s3 + $0x50] sm:$0xff]  }
   0xf   : > { %2403 = vmatprep.subr.bf16.mxu1 %v2621_v3  ;;  %s1989_s13 = sshll.u32 %s3390_s22, 3  ;;  %v2627_v12 = vld [vmem:[%s3353_s3 + $0x18] sm:$0xff]   ;;  %v2796_v14 = vadd.s32 8, %v2777_v10  ;;  %v2802_v16 = vld [vmem:[%s3351_s1] ss:$0 sm:$0xff]  ;;  %v319_v18 = vand.u32 7, %v2777_v10 }
  0x10   : > { %s2790_s23 = scalar_lea.vmem %s3350_s0, %s1989_s13  ;;  %v2807_v17 = vld [vmem:[%s3352_s2] ss:$0 sm:$0xff]  ;;  %v2629_v19 = vld [vmem:[%s3353_s3 + $0x10] sm:$0xff]   ;;  %v2818_v24 = vadd.s32 16, %v2777_v10  ;;  %v2824_v28 = vadd.s32 24, %v2777_v10  ;;  %v2630_v29 = vld [vmem:[%s3353_s3 + $0x48] sm:$0xff]   ;;  %s3329_s29 = scalar_lea.vmem %s3354_s4, %s1989_s13 }
  0x11   : > { %2380 = vmatpush3.bf16.msra.mxu0 %v2620_v2  ;;  %v252_v15 = vld [vmem:[%s2790_s23] sm:$0xff]  ;;  %v253_v21 = vld [vmem:[%s2790_s23 + $0x8] sm:$0xff]  ;;  %v254_v22 = vld [vmem:[%s2790_s23 + $0x10] sm:$0xff]  ;;  %v326_v26 = vand.u32 7, %v2796_v14  ;;  %vm2831_vm0 = vcmp.ge.s32.totalorder %v319_v18, 1  ;;  %v2876_v46 = vadd.s32 32, %v2777_v10 }
  0x12   : > { %2404 = vmatpush3.bf16.msra.mxu1 %v2621_v3  ;;  %2381 = vmatprep.subr.bf16.mxu0 %v2622_v5  ;;  %v267_v20 = vmul.f32 %v2802_v16, %v252_v15  ;;  %v268_v23 = vmul.f32 %v2802_v16, %v253_v21  ;;  %v269_v27 = vmul.f32 %v2802_v16, %v254_v22  ;;  %v2631_v32 = vld [vmem:[%s3353_s3 + $0x8] sm:$0xff]   ;;  %v333_v36 = vand.u32 7, %v2818_v24  ;;  %v2632_v40 = vld [vmem:[%s3353_s3 + $0x40] sm:$0xff]   ;;  %v2634_v44 = vld [vmem:[%s3353_s3 + $0xb8] sm:$0xff]   ;;  %s1992_s22 = sshll.u32 %s3392_s19, 3 }
  0x13   : > { %2405 = vmatprep.subr.bf16.mxu1 %v2623_v6  ;;  %v340_v39 = vand.u32 7, %v2824_v28  ;;  %vm412_vm1 = vcmp.ge.s32.totalorder %v326_v26, 1  ;;  %v2633_v41 = vld [vmem:[%s3353_s3] sm:$0xff]   ;;  %v255_v45 = vld [vmem:[%s2790_s23 + $0x18] sm:$0xff]  ;;  %v257_v50 = vld [vmem:[%s2790_s23 + $0x28] sm:$0xff]  ;;  %v2896_v55 = vadd.s32 40, %v2777_v10  ;;  %s238_s6 = scalar_lea.vmem %s3355_s5, %s1992_s22 }
  0x14   : > { %v282_v25 = vadd.f32 %v2807_v17, %v267_v20  ;;  %v283_v31 = vadd.f32 %v2807_v17, %v268_v23  ;;  %v284_v34 = vadd.f32 %v2807_v17, %v269_v27  ;;  %v427_v42 = vld [vmem:[#allocation2 + $0x7] sm:$0xff]  ;;  %vm2863_vm2 = vmpackc.low %vm412_vm1, %vm2831_vm0  ;;  %vm413_vm3 = vcmp.ge.s32.totalorder %v333_v36, 1  ;;  %v2635_v47 = vld [vmem:[%s3353_s3 + $0xf8] sm:$0xff]  }
  0x15   : > { %2382 = vmatpush3.bf16.msra.mxu0 %v2622_v5  ;;  %vm414_vm4 = vcmp.ge.s32.totalorder %v340_v39, 1  ;;  %v256_v48 = vld [vmem:[%s2790_s23 + $0x20] sm:$0xff]  ;;  %v270_v49 = vmul.f32 %v2802_v16, %v255_v45  ;;  %v258_v56 = vld [vmem:[%s2790_s23 + $0x30] sm:$0xff]  ;;  %v272_v57 = vmul.f32 %v2802_v16, %v257_v50  ;;  %v2906_v62 = vadd.s32 48, %v2777_v10  ;;  %v259_v50 = vld [vmem:[%s2790_s23 + $0x38] sm:$0xff] }
  0x16   : > { %2406 = vmatpush3.bf16.msra.mxu1 %v2623_v6  ;;  %2383 = vmatprep.subr.bf16.mxu0 %v2624_v8  ;;  %v2839_v33 = vmax.f32 %v282_v25, 0.0  ;;  %v2842_v35 = vmax.f32 %v283_v31, 0.0  ;;  %v2848_v38 = vmax.f32 %v284_v34, 0.0  ;;  %vm2890_vm5 = vmpackc.low %vm414_vm4, %vm413_vm3  ;;  %v271_v54 = vmul.f32 %v2802_v16, %v256_v48  ;;  %v2636_v0 = vld [vmem:[%s3353_s3 + $0xb0] sm:$0xff]   ;;  %v2641_v14 = vld [vmem:[%s3353_s3 + $0xe0] sm:$0xff]  }
  0x17   : > { %2407 = vmatprep.subr.bf16.mxu1 %v2625_v9  ;;  %v285_v60 = vadd.f32 %v2807_v17, %v270_v49  ;;  %v273_v61 = vmul.f32 %v2802_v16, %v258_v56  ;;  %v347_v2 = vand.u32 7, %v2876_v46  ;;  %v287_v3 = vadd.f32 %v2807_v17, %v272_v57  ;;  %v2637_v7 = vld [vmem:[%s3353_s3 + $0xf0] sm:$0xff]   ;;  %v2650_v28 = vld [vmem:[%s3353_s3 + $0x138] sm:$0xff]   ;;  %v2657_v30 = vld [vmem:[%s3353_s3 + $0x160] sm:$0xff]  }
  0x18   : > { %298 = vst [vmem:[#allocation2 + $0x10] sm:$0xff] %v2839_v33  ;;  %v487_v37 = vpack.c.bf16 %v2839_v33, %v2698_v4  ;;  %299 = vst [vmem:[#allocation2 + $0x18] sm:$0xff] %v2842_v35  ;;  %v2888_v52 = vpack.c.bf16 %v2848_v38, %v2842_v35  ;;  %v286_v1 = vadd.f32 %v2807_v17, %v271_v54  ;;  %v2917_v5 = vadd.s32 56, %v2777_v10  ;;  %v2644_v56 = vld [vmem:[%s3353_s3 + $0x90] sm:$0xff]   ;;  %v2678_v43 = vld [vmem:[%s3353_s3 + $0x188] sm:$0xff]  }
  0x19   : > { %2384 = vmatpush3.bf16.msra.mxu0 %v2624_v8  ;;  %300 = vst [vmem:[#allocation2 + $0x20] sm:$0xff] %v2848_v38  ;;  %v2928_v8 = vmax.f32 %v285_v60, 0.0  ;;  %v2938_v15 = vmax.f32 %v287_v3, 0.0  ;;  %v361_v21 = vand.u32 7, %v2906_v62  ;;  %vm419_vm6 = vcmp.le.s32.totalorder %v319_v18, 6  ;;  %v2653_v46 = vld [vmem:[%s3353_s3 + $0x170] sm:$0xff]  }
  0x1a   : > { %2408 = vmatpush3.bf16.msra.mxu1 %v2625_v9  ;;  %2385 = vmatprep.subr.bf16.mxu0 %v2626_v11  ;;  %v288_v9 = vadd.f32 %v2807_v17, %v273_v61  ;;  %v368_v25 = vand.u32 7, %v2917_v5  ;;  %vm420_vm7 = vcmp.le.s32.totalorder %v326_v26, 6  ;;  %vm2970_vm8 = vcmp.ge.s32.totalorder %v347_v2, 1  ;;  %v2649_v61 = vld [vmem:[%s3353_s3 + $0xc0] sm:$0xff]   ;;  %v2688_v31 = vld [vmem:[%s3353_s3 + $0x208] sm:$0xff]  }
  0x1b   : > { %2409 = vmatprep.subr.bf16.mxu1 %v2627_v12  ;;  %2393 = vmatprep.mubr.bf16.mxu0 %v487_v37  ;;  %301 = vst [vmem:[#allocation2 + $0x28] sm:$0xff] %v2928_v8  ;;  %303 = vst [vmem:[#allocation2 + $0x38] sm:$0xff] %v2938_v15  ;;  %vm417_vm11 = vcmp.ge.s32.totalorder %v361_v21, 1  ;;  %v274_v54 = vmul.f32 %v2802_v16, %v259_v50  ;;  %v2646_v16 = vld [vmem:[%s3353_s3 + $0x88] sm:$0xff]   ;;  %vm421_vm15 = vcmp.le.s32.totalorder %v333_v36, 6  ;;  %vm422_vm0 = vcmp.le.s32.totalorder %v340_v39, 6 }
  0x1c   : > { %v2947_v20 = vmax.f32 %v288_v9, 0.0  ;;  %vm2986_vm10 = vmpackc.low %vm420_vm7, %vm419_vm6  ;;  %vm418_vm12 = vcmp.ge.s32.totalorder %v368_v25, 1  ;;  %v2651_v36 = vld [vmem:[%s3353_s3 + $0x178] sm:$0xff]   ;;  %vm423_vm3 = vcmp.le.s32.totalorder %v347_v2, 6  ;;  %v2652_v9 = vld [vmem:[%s3353_s3 + $0x130] sm:$0xff]   ;;  %vm425_vm7 = vcmp.le.s32.totalorder %v361_v21, 6 }
  0x1d   : > { %2386 = vmatpush3.bf16.msra.mxu0 %v2626_v11  ;;  %v2638_v11 = vld [vmem:[%s3353_s3 + $0xa8] sm:$0xff]   ;;  %vm3018_vm14 = vmpackc.low %vm418_vm12, %vm417_vm11  ;;  %v289_v57 = vadd.f32 %v2807_v17, %v274_v54  ;;  %v2648_v17 = vld [vmem:[%s3353_s3 + $0x80] sm:$0xff]   ;;  %v1075_v50 = vpack.c.bf16 %v2928_v8, %v2848_v38 }
  0x1e   : > { %2410 = vmatpush3.bf16.msra.mxu1 %v2627_v12  ;;  %2387 = vmatprep.subr.bf16.mxu0 %v2628_v13  ;;  %v2935_v12 = vmax.f32 %v286_v1, 0.0  ;;  %304 = vst [vmem:[#allocation2 + $0x40] sm:$0xff] %v2947_v20  ;;  %v2976_v10 = vpack.c.bf16 %v2947_v20, %v2938_v15  ;;  %vm3071_vm1 = vmpackc.low %vm422_vm0, %vm421_vm15  ;;  %v2670_v38 = vld [vmem:[%s3353_s3 + $0x1a8] sm:$0xff]   ;;  %v2685_v53 = vld [vmem:[%s3353_s3 + $0x220] sm:$0xff]  }
  0x1f   : > { %2411 = vmatprep.subr.bf16.mxu1 %v2629_v19  ;;  %v2884_v51 = vld [vmem:[#allocation2 + $0xf] sm:$0xff]  ;;  %v2901_v59 = vld [vmem:[#allocation2 + $0x17] sm:$0xff]  ;;  %v2689_v37 = vld [vmem:[%s3353_s3 + $0x200] sm:$0xff]  }
  0x20   : > { %v2028_v58 = vpack.c.bf16 %v2884_v51, %v427_v42  ;;  %v2908_v63 = vld [vmem:[#allocation2 + $0x1f] sm:$0xff]  ;;  %302 = vst [vmem:[#allocation2 + $0x30] sm:$0xff] %v2935_v12  ;;  %v2953_v22 = vpack.c.bf16 %v2935_v12, %v2928_v8  ;;  %v1076_v23 = vpack.c.bf16 %v2938_v15, %v2935_v12  ;;  %v734_v27 = vld [vmem:[#allocation2 + $0x9] sm:$0xff]  ;;  %v2978_v18 = vld [vmem:[#allocation2 + $0x11] sm:$0xff]  ;;  %v2100_v49 = vpack.c.bf16 %v2901_v59, %v2884_v51 }
  0x21   : > { %2388 = vmatpush3.bf16.msra.mxu0 %v2628_v13  ;;  %v2923_v6 = vpack.c.bf16 %v2908_v63, %v2901_v59  ;;  %v354_v13 = vand.u32 7, %v2896_v55  ;;  %v2064_v26 = vpack.c.bf16 %v2978_v18, %v734_v27  ;;  %v2645_v51 = vld [vmem:[%s3353_s3 + $0xd0] sm:$0xff]   ;;  %v2647_v59 = vld [vmem:[%s3353_s3 + $0xc8] sm:$0xff]   ;;  %v2672_v12 = vld [vmem:[%s3353_s3 + $0x1a0] sm:$0xff]  }
  0x22   : > { %2412 = vmatpush3.bf16.msra.mxu1 %v2629_v19  ;;  %2389 = vmatprep.subr.bf16.mxu0 %v2630_v29  ;;  %v2639_v19 = vld [vmem:[%s3353_s3 + $0xe8] sm:$0xff]   ;;  %v2673_v15 = vld [vmem:[%s3353_s3 + $0x1e0] sm:$0xff]  }
  0x23   : > { %2413 = vmatprep.subr.bf16.mxu1 %v2631_v32  ;;  %2417 = vmatprep.mubr.msk.bf16.mxu1 %vm2863_vm2, %v2028_v58  ;;  %vm416_vm9 = vcmp.ge.s32.totalorder %v354_v13, 1  ;;  %v2997_v34 = vld [vmem:[#allocation2 + $0x27] sm:$0xff]  ;;  %v3048_v58 = vmax.f32 %v289_v57, 0.0  ;;  %vm424_vm4 = vcmp.le.s32.totalorder %v354_v13, 6 }
  0x24   : > { %vm3001_vm13 = vmpackc.low %vm416_vm9, %vm2970_vm8  ;;  %v3075_v24 = vld [vmem:[#allocation2 + $0x21] sm:$0xff]  ;;  %vm426_vm8 = vcmp.le.s32.totalorder %v368_v25, 6 }
  0x25   : > { %2390 = vmatpush3.bf16.msra.mxu0 %v2630_v29  ;;  %v2640_v29 = vld [vmem:[%s3353_s3 + $0xa0] sm:$0xff]   ;;  %305 = vst [vmem:[#allocation2 + $0x48] sm:$0xff] %v3048_v58  ;;  %v3059_v60 = vpack.c.bf16 %v2698_v4, %v3048_v58  ;;  %vm3102_vm6 = vmpackc.low %vm424_vm4, %vm423_vm3 }
  0x26   : > { %2414 = vmatpush3.bf16.msra.mxu1 %v2631_v32  ;;  %2391 = vmatprep.subr.bf16.mxu0 %v2632_v40  ;;  %v2642_v32 = vld [vmem:[%s3353_s3 + $0x98] sm:$0xff]   ;;  %vm3142_vm9 = vmpackc.low %vm426_vm8, %vm425_vm7  ;;  %v2656_v25 = vld [vmem:[%s3353_s3 + $0x120] sm:$0xff]  }
  0x27   : > { %2415 = vmatprep.subr.bf16.mxu1 %v2633_v41  ;;  %v736_v4 = vld [vmem:[#allocation2 + $0x19] sm:$0xff]  ;;  %v3085_v39 = vld [vmem:[#allocation2 + $0x29] sm:$0xff]  ;;  %v3092_v3 = vld [vmem:[#allocation2 + $0x31] sm:$0xff] }
  0x28   : > { %v3088_v1 = vpack.c.bf16 %v3075_v24, %v736_v4  ;;  %v3108_v2 = vpack.c.bf16 %v3092_v3, %v3085_v39  ;;  %v2163_v54 = vpack.c.bf16 %v3085_v39, %v3075_v24  ;;  %v2682_v24 = vld [vmem:[%s3353_s3 + $0x238] sm:$0xff]   ;;  %v2684_v39 = vld [vmem:[%s3353_s3 + $0x228] sm:$0xff]  }
  0x29   : > { %2392 = vmatpush3.bf16.msra.mxu0 %v2632_v40  ;;  %v3006_v40 = vld [vmem:[#allocation2 + $0x2f] sm:$0xff] }
  0x2a   : > { %2416 = vmatpush3.bf16.msra.mxu1 %v2633_v41  ;;  %2425 = vmatprep.subr.bf16.mxu0 %v2634_v44  ;;  %v3008_v41 = vld [vmem:[#allocation2 + $0x37] sm:$0xff]  ;;  %v3014_v42 = vpack.c.bf16 %v3006_v40, %v2997_v34 }
  0x2b   : > { %2449 = vmatprep.subr.bf16.mxu1 %v2635_v47  ;;  %v2106_v13 = vpack.c.bf16 %v3008_v41, %v3006_v40  ;;  %v2663_v40 = vld [vmem:[%s3353_s3 + $0x148] sm:$0xff]  }
  0x2c   : > { %2394 = vmatmul.mubr.bf16.vlgmr.msra.gmra.mxu0 %v2888_v52  ;;  %v3128_v27 = vld [vmem:[#allocation2 + $0x47] sm:$0xff] }
  0x2d   : > { %2418 = vmatmul.mubr.msk.bf16.vlgmr.msra.gmra.mxu1 %vm2890_vm5, %v2923_v6  ;;  %2426 = vmatpush3.bf16.msra.mxu0 %v2634_v44  ;;  %v3016_v44 = vld [vmem:[#allocation2 + $0x3f] sm:$0xff]  ;;  %v3211_v8 = vld [vmem:[#allocation2 + $0x49] sm:$0xff] }
  0x2e   : > { %2450 = vmatpush3.bf16.msra.mxu1 %v2635_v47  ;;  %2427 = vmatprep.subr.bf16.mxu0 %v2636_v0  ;;  %v2643_v47 = vld [vmem:[%s3353_s3 + $0xd8] sm:$0xff]   ;;  %v3027_v48 = vpack.c.bf16 %v3016_v44, %v3008_v41  ;;  %v2109_v21 = vpack.c.bf16 %v3128_v27, %v3016_v44  ;;  %v2664_v41 = vld [vmem:[%s3353_s3 + $0x100] sm:$0xff]  }
  0x2f   : > { %2451 = vmatprep.subr.bf16.mxu1 %v2637_v7  ;;  %2397 = vmatprep.mubr.bf16.mxu0 %v2953_v22  ;;  %v2665_v44 = vld [vmem:[%s3353_s3 + $0x140] sm:$0xff]  }
  0x30   : > { %2421 = vmatprep.mubr.msk.bf16.mxu1 %vm3001_vm13, %v3014_v42 }
  0x31   : > { %2428 = vmatpush3.bf16.msra.mxu0 %v2636_v0 }
  0x32   : > { %2452 = vmatpush3.bf16.msra.mxu1 %v2637_v7  ;;  %2429 = vmatprep.subr.bf16.mxu0 %v2638_v11  ;;  %v2103_v7 = vpack.c.bf16 %v2997_v34, %v2908_v63  ;;  %v3110_v63 = vld [vmem:[#allocation2 + $0x39] sm:$0xff]  ;;  %v2662_v34 = vld [vmem:[%s3353_s3 + $0x108] sm:$0xff]  }
  0x33   : > { %2453 = vmatprep.subr.bf16.mxu1 %v2639_v19  ;;  %v2166_v57 = vpack.c.bf16 %v3110_v63, %v3092_v3 }
  0x34   : > { %2398 = vmatmul.mubr.bf16.gmra.mxu0 %v2976_v10 }
  0x35   : > { %2430 = vmatpush3.bf16.msra.mxu0 %v2638_v11  ;;  %2441 = vmatprep.mubr.msk.bf16.mxu0 %vm2986_vm10, %v2064_v26  ;;  %v2654_v11 = vld [vmem:[%s3353_s3 + $0x128] sm:$0xff]   ;;  %v2160_v26 = vpack.c.bf16 %v736_v4, %v2978_v18  ;;  %v2661_v18 = vld [vmem:[%s3353_s3 + $0x150] sm:$0xff]   ;;  %v2681_v4 = vld [vmem:[%s3353_s3 + $0x1c0] sm:$0xff]  }
  0x36   : > { %2454 = vmatpush3.bf16.msra.mxu1 %v2639_v19  ;;  %2431 = vmatprep.subr.bf16.mxu0 %v2640_v29  ;;  %v3124_v19 = vld [vmem:[#allocation2 + $0x41] sm:$0xff] }
  0x37   : > { %2455 = vmatprep.subr.bf16.mxu1 %v2641_v14  ;;  %2422 = vmatmul.mubr.msk.bf16.gmra.mxu1 %vm3018_vm14, %v3027_v48  ;;  %v3138_v62 = vpack.c.bf16 %v3124_v19, %v3110_v63 }
  0x38   : > { %2465 = vmatprep.mubr.msk.bf16.mxu1 %vm2863_vm2, %v2100_v49  ;;  %v2667_v49 = vld [vmem:[%s3353_s3 + $0x1f8] sm:$0xff]  }
  0x39   : > { %2432 = vmatpush3.bf16.msra.mxu0 %v2640_v29  ;;  %v2655_v29 = vld [vmem:[%s3353_s3 + $0x168] sm:$0xff]  }
  0x3a   : > { %2456 = vmatpush3.bf16.msra.mxu1 %v2641_v14  ;;  %2433 = vmatprep.subr.bf16.mxu0 %v2642_v32  ;;  %v1074_v14 = vpack.c.bf16 %v2842_v35, %v2839_v33  ;;  %v2659_v33 = vld [vmem:[%s3353_s3 + $0x158] sm:$0xff]   ;;  %v2660_v35 = vld [vmem:[%s3353_s3 + $0x110] sm:$0xff]  }
  0x3b   : > { %2457 = vmatprep.subr.bf16.mxu1 %v2643_v47 }
  0x3d   : > { %2434 = vmatpush3.bf16.msra.mxu0 %v2642_v32  ;;  %v2658_v32 = vld [vmem:[%s3353_s3 + $0x118] sm:$0xff]  }
  0x3e   : > { %2458 = vmatpush3.bf16.msra.mxu1 %v2643_v47  ;;  %2435 = vmatprep.subr.bf16.mxu0 %v2644_v56  ;;  %v2666_v47 = vld [vmem:[%s3353_s3 + $0x1b8] sm:$0xff]  }
  0x3f   : > { %2459 = vmatprep.subr.bf16.mxu1 %v2645_v51 }
  0x41   : > { %2436 = vmatpush3.bf16.msra.mxu0 %v2644_v56  ;;  %v2668_v56 = vld [vmem:[%s3353_s3 + $0x1b0] sm:$0xff]  }
  0x42   : > { %2460 = vmatpush3.bf16.msra.mxu1 %v2645_v51  ;;  %2437 = vmatprep.subr.bf16.mxu0 %v2646_v16  ;;  %v2669_v51 = vld [vmem:[%s3353_s3 + $0x1f0] sm:$0xff]  }
  0x43   : > { %2461 = vmatprep.subr.bf16.mxu1 %v2647_v59 }
  0x45   : > { %2438 = vmatpush3.bf16.msra.mxu0 %v2646_v16  ;;  %v2671_v16 = vld [vmem:[%s3353_s3 + $0x1e8] sm:$0xff]  }
  0x46   : > { %2462 = vmatpush3.bf16.msra.mxu1 %v2647_v59  ;;  %2439 = vmatprep.subr.bf16.mxu0 %v2648_v17  ;;  %v1077_v59 = vpack.c.bf16 %v3048_v58, %v2947_v20  ;;  %v2674_v20 = vld [vmem:[%s3353_s3 + $0x198] sm:$0xff]   ;;  %v2676_v58 = vld [vmem:[%s3353_s3 + $0x190] sm:$0xff]  }
  0x47   : > { %2463 = vmatprep.subr.bf16.mxu1 %v2649_v61 }
  0x49   : > { %2440 = vmatpush3.bf16.msra.mxu0 %v2648_v17  ;;  %v2169_v17 = vpack.c.bf16 %v3211_v8, %v3124_v19 }
  0x4a   : > { %2464 = vmatpush3.bf16.msra.mxu1 %v2649_v61  ;;  %2473 = vmatprep.subr.bf16.mxu0 %v2650_v28  ;;  %v2677_v61 = vld [vmem:[%s3353_s3 + $0x1d0] sm:$0xff]  }
  0x4b   : > { %2497 = vmatprep.subr.bf16.mxu1 %v2651_v36 }
  0x4c   : > { %2442 = vmatmul.mubr.msk.bf16.vlgmr.msra.gmra.mxu0 %vm3071_vm1, %v3088_v1 }
  0x4d   : > { %2466 = vmatmul.mubr.msk.bf16.vlgmr.msra.gmra.mxu1 %vm2890_vm5, %v2103_v7  ;;  %2474 = vmatpush3.bf16.msra.mxu0 %v2650_v28  ;;  %v2683_v28 = vld [vmem:[%s3353_s3 + $0x230] sm:$0xff]  }
  0x4e   : > { %2498 = vmatpush3.bf16.msra.mxu1 %v2651_v36  ;;  %2475 = vmatprep.subr.bf16.mxu0 %v2652_v9  ;;  %v1381_v36 = vld [vmem:[#allocation2 + $0x4f] sm:$0xff] }
  0x4f   : > { %2499 = vmatprep.subr.bf16.mxu1 %v2653_v46  ;;  %2445 = vmatprep.mubr.msk.bf16.mxu0 %vm3102_vm6, %v3108_v2  ;;  %v2205_v3 = vpack.c.bf16 %v1381_v36, %v3128_v27 }
  0x50   : > { %2469 = vmatprep.mubr.msk.bf16.mxu1 %vm3001_vm13, %v2106_v13 }
  0x51   : > { %2476 = vmatpush3.bf16.msra.mxu0 %v2652_v9 }
  0x52   : > { %2500 = vmatpush3.bf16.msra.mxu1 %v2653_v46  ;;  %2477 = vmatprep.subr.bf16.mxu0 %v2654_v11 }
  0x53   : > { %2501 = vmatprep.subr.bf16.mxu1 %v2655_v29 }
  0x54   : > { %2446 = vmatmul.mubr.msk.bf16.gmra.mxu0 %vm3142_vm9, %v3138_v62 }
  0x55   : > { %2478 = vmatpush3.bf16.msra.mxu0 %v2654_v11  ;;  %2470 = vmatmul.mubr.msk.bf16.gmra.mxu1 %vm3018_vm14, %v2109_v21 }
  0x56   : > { %2502 = vmatpush3.bf16.msra.mxu1 %v2655_v29  ;;  %2479 = vmatprep.subr.bf16.mxu0 %v2656_v25 }
  0x57   : > { %2503 = vmatprep.subr.bf16.mxu1 %v2657_v30  ;;  %2489 = vmatprep.mubr.bf16.mxu0 %v1074_v14 }
  0x58   : > { %2513 = vmatprep.mubr.msk.bf16.mxu1 %vm2986_vm10, %v2160_v26 }
  0x59   : > { %2480 = vmatpush3.bf16.msra.mxu0 %v2656_v25 }
  0x5a   : > { %2504 = vmatpush3.bf16.msra.mxu1 %v2657_v30  ;;  %2481 = vmatprep.subr.bf16.mxu0 %v2658_v32 }
  0x5b   : > { %2505 = vmatprep.subr.bf16.mxu1 %v2659_v33 }
  0x5d   : > { %2482 = vmatpush3.bf16.msra.mxu0 %v2658_v32 }
  0x5e   : > { %2506 = vmatpush3.bf16.msra.mxu1 %v2659_v33  ;;  %2483 = vmatprep.subr.bf16.mxu0 %v2660_v35 }
  0x5f   : > { %2507 = vmatprep.subr.bf16.mxu1 %v2661_v18 }
  0x61   : > { %2484 = vmatpush3.bf16.msra.mxu0 %v2660_v35 }
  0x62   : > { %2508 = vmatpush3.bf16.msra.mxu1 %v2661_v18  ;;  %2485 = vmatprep.subr.bf16.mxu0 %v2662_v34 }
  0x63   : > { %2509 = vmatprep.subr.bf16.mxu1 %v2663_v40 }
  0x65   : > { %2486 = vmatpush3.bf16.msra.mxu0 %v2662_v34 }
  0x66   : > { %2510 = vmatpush3.bf16.msra.mxu1 %v2663_v40  ;;  %2487 = vmatprep.subr.bf16.mxu0 %v2664_v41 }
  0x67   : > { %2511 = vmatprep.subr.bf16.mxu1 %v2665_v44 }
  0x69   : > { %2488 = vmatpush3.bf16.msra.mxu0 %v2664_v41 }
  0x6a   : > { %2512 = vmatpush3.bf16.msra.mxu1 %v2665_v44  ;;  %2521 = vmatprep.subr.bf16.mxu0 %v2666_v47 }
  0x6b   : > { %2545 = vmatprep.subr.bf16.mxu1 %v2667_v49 }
  0x6c   : > { %2490 = vmatmul.mubr.bf16.vlgmr.msra.gmra.mxu0 %v1075_v50 }
  0x6d   : > { %2514 = vmatmul.mubr.msk.bf16.vlgmr.msra.gmra.mxu1 %vm3071_vm1, %v2163_v54  ;;  %2522 = vmatpush3.bf16.msra.mxu0 %v2666_v47 }
  0x6e   : > { %2546 = vmatpush3.bf16.msra.mxu1 %v2667_v49  ;;  %2523 = vmatprep.subr.bf16.mxu0 %v2668_v56 }
  0x6f   : > { %2547 = vmatprep.subr.bf16.mxu1 %v2669_v51  ;;  %2493 = vmatprep.mubr.bf16.mxu0 %v1076_v23  ;;  %v2675_v23 = vld [vmem:[%s3353_s3 + $0x1d8] sm:$0xff]  }
  0x70   : > { %2517 = vmatprep.mubr.msk.bf16.mxu1 %vm3102_vm6, %v2166_v57 }
  0x71   : > { %2524 = vmatpush3.bf16.msra.mxu0 %v2668_v56 }
  0x72   : > { %2548 = vmatpush3.bf16.msra.mxu1 %v2669_v51  ;;  %2525 = vmatprep.subr.bf16.mxu0 %v2670_v38 }
  0x73   : > { %2549 = vmatprep.subr.bf16.mxu1 %v2671_v16 }
  0x74   : > { %2494 = vmatmul.mubr.bf16.gmra.mxu0 %v1077_v59 }
  0x75   : > { %2526 = vmatpush3.bf16.msra.mxu0 %v2670_v38  ;;  %2518 = vmatmul.mubr.msk.bf16.gmra.mxu1 %vm3142_vm9, %v2169_v17 }
  0x76   : > { %2550 = vmatpush3.bf16.msra.mxu1 %v2671_v16  ;;  %2527 = vmatprep.subr.bf16.mxu0 %v2672_v12 }
  0x77   : > { %2551 = vmatprep.subr.bf16.mxu1 %v2673_v15  ;;  %2537 = vmatprep.mubr.msk.bf16.mxu0 %vm2863_vm2, %v2923_v6  ;;  %v2680_v6 = vld [vmem:[%s3353_s3 + $0x180] sm:$0xff]   ;;  %vm1891_vm2 = vcmask 1040384  }
  0x78   : > { %2561 = vmatprep.mubr.bf16.mxu1 %v2888_v52  ;;  %v2679_v52 = vld [vmem:[%s3353_s3 + $0x1c8] sm:$0xff]  }
  0x79   : > { %2528 = vmatpush3.bf16.msra.mxu0 %v2672_v12 }
  0x7a   : > { %2552 = vmatpush3.bf16.msra.mxu1 %v2673_v15  ;;  %2529 = vmatprep.subr.bf16.mxu0 %v2674_v20 }
  0x7b   : > { %2553 = vmatprep.subr.bf16.mxu1 %v2675_v23 }
  0x7d   : > { %2530 = vmatpush3.bf16.msra.mxu0 %v2674_v20 }
  0x7e   : > { %2554 = vmatpush3.bf16.msra.mxu1 %v2675_v23  ;;  %2531 = vmatprep.subr.bf16.mxu0 %v2676_v58 }
  0x7f   : > { %2555 = vmatprep.subr.bf16.mxu1 %v2677_v61 }
  0x81   : > { %2532 = vmatpush3.bf16.msra.mxu0 %v2676_v58 }
  0x82   : > { %2556 = vmatpush3.bf16.msra.mxu1 %v2677_v61  ;;  %2533 = vmatprep.subr.bf16.mxu0 %v2678_v43 }
  0x83   : > { %2557 = vmatprep.subr.bf16.mxu1 %v2679_v52 }
  0x85   : > { %2534 = vmatpush3.bf16.msra.mxu0 %v2678_v43 }
  0x86   : > { %2558 = vmatpush3.bf16.msra.mxu1 %v2679_v52  ;;  %2535 = vmatprep.subr.bf16.mxu0 %v2680_v6 }
  0x87   : > { %2559 = vmatprep.subr.bf16.mxu1 %v2681_v4 }
  0x89   : > { %2536 = vmatpush3.bf16.msra.mxu0 %v2680_v6 }
  0x8a   : > { %2560 = vmatpush3.bf16.msra.mxu1 %v2681_v4  ;;  %2569 = vmatprep.subr.bf16.mxu0 %v2682_v24 }
  0x8b   : > { %2593 = vmatprep.subr.bf16.mxu1 %v2682_v24 }
  0x8c   : > { %2538 = vmatmul.mubr.msk.bf16.vlgmr.msra.gmra.mxu0 %vm2890_vm5, %v3014_v42  ;;  %v1689_v42 = vld [vmem:[#allocation2 + $0x51] sm:$0xff]  ;;  %vm1893_vm5 = vcmask 1041408  }
  0x8d   : > { %2562 = vmatmul.mubr.bf16.vlgmr.msra.gmra.mxu1 %v2953_v22  ;;  %2570 = vmatpush3.bf16.msra.mxu0 %v2682_v24  ;;  %v2686_v22 = vld [vmem:[%s3353_s3 + $0x218] sm:$0xff]   ;;  %v2265_v45 = vpack.c.bf16 %v1689_v42, %v3211_v8 }
  0x8e   : > { %2601 = vmatpush3.bf16.msra.mxu1 %v2682_v24  ;;  %2571 = vmatprep.subr.bf16.mxu0 %v2683_v28 }
  0x8f   : > { %2594 = vmatprep.subr.bf16.mxu1 %v2683_v28  ;;  %2541 = vmatprep.mubr.msk.bf16.mxu0 %vm3001_vm13, %v3027_v48 }
  0x90   : > { %2565 = vmatprep.mubr.bf16.mxu1 %v2976_v10  ;;  %v2687_v10 = vld [vmem:[%s3353_s3 + $0x210] sm:$0xff]  }
  0x91   : > { %2572 = vmatpush3.bf16.msra.mxu0 %v2683_v28 }
  0x92   : > { %2602 = vmatpush3.bf16.msra.mxu1 %v2683_v28  ;;  %2573 = vmatprep.subr.bf16.mxu0 %v2684_v39 }
  0x93   : > { %2595 = vmatprep.subr.bf16.mxu1 %v2684_v39 }
  0x94   : > { %2542 = vmatmul.mubr.msk.bf16.gmra.mxu0 %vm3018_vm14, %v2205_v3 }
  0x95   : > { %2574 = vmatpush3.bf16.msra.mxu0 %v2684_v39  ;;  %2566 = vmatmul.mubr.bf16.gmra.mxu1 %v3059_v60 }
  0x96   : > { %2603 = vmatpush3.bf16.msra.mxu1 %v2684_v39  ;;  %2575 = vmatprep.subr.bf16.mxu0 %v2685_v53 }
  0x97   : > { %2596 = vmatprep.subr.bf16.mxu1 %v2685_v53  ;;  %2585 = vmatprep.mubr.msk.bf16.mxu0 %vm2986_vm10, %v3088_v1 }
  0x98   : > { %2589 = vmatprep.mubr.msk.bf16.mxu1 %vm3102_vm6, %v3138_v62 }
  0x99   : > { %2576 = vmatpush3.bf16.msra.mxu0 %v2685_v53 }
  0x9a   : > { %2604 = vmatpush3.bf16.msra.mxu1 %v2685_v53  ;;  %2577 = vmatprep.subr.bf16.mxu0 %v2686_v22 }
  0x9b   : > { %2597 = vmatprep.subr.bf16.mxu1 %v2686_v22 }
  0x9d   : > { %2578 = vmatpush3.bf16.msra.mxu0 %v2686_v22 }
  0x9e   : > { %2605 = vmatpush3.bf16.msra.mxu1 %v2686_v22  ;;  %2579 = vmatprep.subr.bf16.mxu0 %v2687_v10 }
  0x9f   : > { %2598 = vmatprep.subr.bf16.mxu1 %v2687_v10 }
  0xa1   : > { %2580 = vmatpush3.bf16.msra.mxu0 %v2687_v10 }
  0xa2   : > { %2606 = vmatpush3.bf16.msra.mxu1 %v2687_v10  ;;  %2581 = vmatprep.subr.bf16.mxu0 %v2688_v31 }
  0xa3   : > { %2599 = vmatprep.subr.bf16.mxu1 %v2688_v31 }
  0xa5   : > { %2582 = vmatpush3.bf16.msra.mxu0 %v2688_v31 }
  0xa6   : > { %2607 = vmatpush3.bf16.msra.mxu1 %v2688_v31  ;;  %2583 = vmatprep.subr.bf16.mxu0 %v2689_v37 }
  0xa7   : > { %2600 = vmatprep.subr.bf16.mxu1 %v2689_v37 }
  0xa9   : > { %2584 = vmatpush3.bf16.msra.mxu0 %v2689_v37 }
  0xaa   : > { %2608 = vmatpush3.bf16.msra.mxu1 %v2689_v37 }
  0xac   : > { %2586 = vmatmul.mubr.msk.bf16.vlgmr.msra.gmra.mxu0 %vm3071_vm1, %v3108_v2 }
  0xad   : > { %2590 = vmatmul.mubr.msk.bf16.vlgmr.msra.gmra.mxu1 %vm3142_vm9, %v2265_v45 }
  0xec   : > { %v2395_v48 = vpop.f32.mrf.mxu0 }
  0xed   : > { %v2419_v60 = vpop.f32.mrf.mxu1 }
  0xee   : > { %v590_v1 = vpop.f32.mrf.mxu0  ;;  %v712_v36 = vadd.f32 %v2419_v60, %v2395_v48 }
  0xef   : > { %v703_v7 = vpop.f32.mrf.mxu1 }
  0xf0   : > { %v2396_v9 = vpop.f32.mrf.mxu0  ;;  %v704_v53 = vadd.f32 %v703_v7, %v590_v1 }
  0xf1   : > { %v2420_v46 = vpop.f32.mrf.mxu1 }
  0xf2   : > { %v593_v55 = vpop.f32.mrf.mxu0  ;;  %v715_v42 = vadd.f32 %v2420_v46, %v2396_v9 }
  0xf3   : > { %v706_v63 = vpop.f32.mrf.mxu1 }
  0xf4   : > { %v2399_v11 = vpop.f32.mrf.mxu0 }
  0xf6   : > { %v606_v19 = vpop.f32.mrf.mxu0 }
  0xf7   : > { %v2423_v13 = vpop.f32.mrf.mxu1 }
  0xf8   : > { %v2400_v29 = vpop.f32.mrf.mxu0  ;;  %v728_v39 = vadd.f32 %v2423_v13, %v2399_v11 }
  0xf9   : > { %v719_v27 = vpop.f32.mrf.mxu1 }
  0xfa   : > { %v609_v21 = vpop.f32.mrf.mxu0  ;;  %v720_v31 = vadd.f32 %v719_v27, %v606_v19 }
  0xfb   : > { %v2424_v62 = vpop.f32.mrf.mxu1 }
  0xfd   : > { %v722_v0 = vpop.f32.mrf.mxu1 }
  0xfe   : > { %v723_v11 = vadd.f32 %v722_v0, %v609_v21 }
 0x10c   : > { %v2443_v2 = vpop.f32.mrf.mxu0 }
 0x10d   : > { %v2467_v25 = vpop.f32.mrf.mxu1  ;;  %v902_v22 = vadd.f32 %v2443_v2, %v712_v36 }
 0x10e   : > { %v869_v5 = vpop.f32.mrf.mxu0 }
 0x10f   : > { %v1027_v30 = vpop.f32.mrf.mxu1  ;;  %v900_v45 = vadd.f32 %v869_v5, %v704_v53 }
 0x110   : > { %v2444_v14 = vpop.f32.mrf.mxu0 }
 0x111   : > { %v2468_v26 = vpop.f32.mrf.mxu1  ;;  %v903_v48 = vadd.f32 %v2444_v14, %v715_v42  ;;  %v1058_v7 = vadd.f32 %v1027_v30, %v900_v45 }
 0x112   : > { %v872_v32 = vpop.f32.mrf.mxu0 }
 0x113   : > { %v3309_v33 = vpop.f32.mrf.mxu1 }
 0x114   : > { %3377 = vst [vmem:[#allocation3_spill] sm:$0xff] %v3309_v33  ;;  %v2447_v35 = vpop.f32.mrf.mxu0 }
 0x115   : > { %v2471_v18 = vpop.f32.mrf.mxu1  ;;  %v906_v37 = vadd.f32 %v2447_v35, %v728_v39  ;;  %v1061_v39 = vadd.f32 %v2468_v26, %v903_v48 }
 0x116   : > { %v885_v34 = vpop.f32.mrf.mxu0 }
 0x117   : > { %v1043_v40 = vpop.f32.mrf.mxu1  ;;  %v1064_v13 = vadd.f32 %v2471_v18, %v906_v37 }
 0x118   : > { %v2448_v41 = vpop.f32.mrf.mxu0 }
 0x119   : > { %v2472_v44 = vpop.f32.mrf.mxu1 }
 0x11a   : > { %v888_v47 = vpop.f32.mrf.mxu0 }
 0x11b   : > { %v1046_v49 = vpop.f32.mrf.mxu1  ;;  %v905_v19 = vadd.f32 %v888_v47, %v723_v11  ;;  %v3383_v5 = vld [vmem:[#allocation3_spill] sm:$0xff] }
 0x11d   : > { %v1063_v14 = vadd.f32 %v1046_v49, %v905_v19 }
 0x12c   : > { %v2491_v50 = vpop.f32.mrf.mxu0 }
 0x12d   : > { %v2515_v54 = vpop.f32.mrf.mxu1 }
 0x12e   : > { %v1177_v56 = vpop.f32.mrf.mxu0 }
 0x12f   : > { %v1335_v51 = vpop.f32.mrf.mxu1  ;;  %v1208_v9 = vadd.f32 %v1177_v56, %v1058_v7 }
 0x130   : > { %v2492_v57 = vpop.f32.mrf.mxu0 }
 0x131   : > { %v3311_v38 = vpop.f32.mrf.mxu1  ;;  %v1366_v30 = vadd.f32 %v1335_v51, %v1208_v9 }
 0x132   : > { %3378 = vst [vmem:[#allocation4_spill] sm:$0xff] %v3311_v38  ;;  %v1180_v8 = vpop.f32.mrf.mxu0  ;;  %v904_v38 = vadd.f32 %v885_v34, %v720_v31 }
 0x133   : > { %v3313_v16 = vpop.f32.mrf.mxu1 }
 0x134   : > { %3379 = vst [vmem:[#allocation5_spill] sm:$0xff] %v3313_v16  ;;  %v2495_v59 = vpop.f32.mrf.mxu0  ;;  %v731_v16 = vadd.f32 %v2424_v62, %v2400_v29 }
 0x135   : > { %v2519_v17 = vpop.f32.mrf.mxu1  ;;  %v1214_v27 = vadd.f32 %v2495_v59, %v1064_v13 }
 0x136   : > { %v1193_v12 = vpop.f32.mrf.mxu0  ;;  %v907_v1 = vadd.f32 %v2448_v41, %v731_v16 }
 0x137   : > { %v1351_v15 = vpop.f32.mrf.mxu1  ;;  %v1372_v21 = vadd.f32 %v2519_v17, %v1214_v27 }
 0x138   : > { %v2496_v20 = vpop.f32.mrf.mxu0  ;;  %v1065_v29 = vadd.f32 %v2472_v44, %v907_v1 }
 0x139   : > { %v2520_v23 = vpop.f32.mrf.mxu1 }
 0x13a   : > { %v1196_v58 = vpop.f32.mrf.mxu0  ;;  %v1215_v0 = vadd.f32 %v2496_v20, %v1065_v29 }
 0x13b   : > { %v1354_v61 = vpop.f32.mrf.mxu1  ;;  %v1213_v47 = vadd.f32 %v1196_v58, %v1063_v14 }
 0x13d   : > { %v1371_v20 = vadd.f32 %v1354_v61, %v1213_v47 }
 0x14c   : > { %v2539_v43 = vpop.f32.mrf.mxu0 }
 0x14d   : > { %v2563_v52 = vpop.f32.mrf.mxu1 }
 0x14e   : > { %v1493_v6 = vpop.f32.mrf.mxu0 }
 0x14f   : > { %v3315_v4 = vpop.f32.mrf.mxu1  ;;  %v1524_v44 = vadd.f32 %v1493_v6, %v1366_v30 }
 0x150   : > { %3380 = vst [vmem:[#allocation6_spill] sm:$0xff] %v3315_v4  ;;  %v2540_v24 = vpop.f32.mrf.mxu0  ;;  %v707_v4 = vadd.f32 %v706_v63, %v593_v55 }
 0x151   : > { %v3317_v28 = vpop.f32.mrf.mxu1 }
 0x152   : > { %3381 = vst [vmem:[#allocation7_spill] sm:$0xff] %v3317_v28  ;;  %v1496_v3 = vpop.f32.mrf.mxu0  ;;  %v1060_v28 = vadd.f32 %v2467_v25, %v902_v22  ;;  %v901_v2 = vadd.f32 %v872_v32, %v707_v4  ;;  %v1211_v25 = vadd.f32 %v2492_v57, %v1061_v39 }
 0x153   : > { %v3319_v10 = vpop.f32.mrf.mxu1 }
 0x154   : > { %3382 = vst [vmem:[#allocation8_spill] sm:$0xff] %v3319_v10  ;;  %v2543_v33 = vpop.f32.mrf.mxu0  ;;  %v1210_v36 = vadd.f32 %v2491_v50, %v1060_v28  ;;  %v1062_v10 = vadd.f32 %v1043_v40, %v904_v38  ;;  %v1059_v55 = vadd.f32 %v3383_v5, %v901_v2  ;;  %v3384_v50 = vld [vmem:[#allocation4_spill] sm:$0xff]  ;;  %v1373_v38 = vadd.f32 %v2520_v23, %v1215_v0 }
 0x155   : > { %v2567_v60 = vpop.f32.mrf.mxu1  ;;  %v1530_v26 = vadd.f32 %v2543_v33, %v1372_v21  ;;  %v1369_v56 = vadd.f32 %v3384_v50, %v1211_v25 }
 0x156   : > { %v1509_v35 = vpop.f32.mrf.mxu0  ;;  %v1212_v62 = vadd.f32 %v1193_v12, %v1062_v10  ;;  %v1368_v63 = vadd.f32 %v2515_v54, %v1210_v36  ;;  %v1209_v32 = vadd.f32 %v1180_v8, %v1059_v55  ;;  %v3385_v54 = vld [vmem:[#allocation5_spill] sm:$0xff] }
 0x157   : > { %v1659_v46 = vpop.f32.mrf.mxu1  ;;  %v1527_v17 = vadd.f32 %v2540_v24, %v1369_v56  ;;  %v1680_v51 = vadd.f32 %v2567_v60, %v1530_v26 }
 0x158   : > { %v2544_v18 = vpop.f32.mrf.mxu0  ;;  %v1526_v34 = vadd.f32 %v2539_v43, %v1368_v63  ;;  %v1370_v41 = vadd.f32 %v1351_v15, %v1212_v62  ;;  %v1367_v57 = vadd.f32 %v3385_v54, %v1209_v32  ;;  %v3386_v15 = vld [vmem:[#allocation6_spill] sm:$0xff] }
 0x159   : > { %v2568_v40 = vpop.f32.mrf.mxu1  ;;  %v1531_v8 = vadd.f32 %v2544_v18, %v1373_v38  ;;  %v1674_v23 = vadd.f32 %v3386_v15, %v1524_v44  ;;  %v3387_v28 = vld [vmem:[#allocation7_spill] sm:$0xff] }
 0x15a   : > { %v1528_v16 = vadd.f32 %v1509_v35, %v1370_v41  ;;  %v1512_v59 = vpop.f32.mrf.mxu0  ;;  %v1676_v49 = vadd.f32 %v2563_v52, %v1526_v34  ;;  %v1525_v58 = vadd.f32 %v1496_v3, %v1367_v57  ;;  %v1677_v53 = vadd.f32 %v3387_v28, %v1527_v17 }
 0x15b   : > { %v1662_v12 = vpop.f32.mrf.mxu1  ;;  %v1529_v4 = vadd.f32 %v1512_v59, %v1371_v20  ;;  %v1681_v31 = vadd.f32 %v2568_v40, %v1531_v8  ;;  %v3388_v42 = vld [vmem:[#allocation8_spill] sm:$0xff] }
 0x15c   : > { %v1678_v6 = vadd.f32 %v1659_v46, %v1528_v16  ;;  %v1675_v45 = vadd.f32 %v3388_v42, %v1525_v58 }
 0x15d   : > { %v1679_v11 = vadd.f32 %v1662_v12, %v1529_v4 }
 0x16c   : > { %v2587_v33 = vpop.f32.mrf.mxu0 }
 0x16d   : > { %v1834_v43 = vadd.f32 %v2587_v33, %v1676_v49  ;;  %v2591_v52 = vpop.f32.mrf.mxu1 }
 0x16e   : > { %v1838_v61 = vadd.f32 %v2591_v52, %v1680_v51  ;;  %v1801_v24 = vpop.f32.mrf.mxu0 }
 0x16f   : > { %1842 = vst [vmem:[%s3329_s29 + $0x10] sm:$0xff] %v1834_v43  ;;  %v1832_v22 = vadd.f32 %v1801_v24, %v1674_v23  ;;  %v1817_v10 = vpop.f32.mrf.mxu1 }
 0x170   : > { %1846 = vst [vmem:[%s3329_s29 + $0x30] sm:$0xff] %v1838_v61  ;;  %v1836_v37 = vadd.f32 %v1817_v10, %v1678_v6  ;;  %v2588_v3 = vpop.f32.mrf.mxu0 }
 0x171   : > { %1840 = vst [vmem:[%s3329_s29] sm:$0xff] %v1832_v22  ;;  %v1835_v48 = vadd.f32 %v2588_v3, %v1677_v53  ;;  %v2592_v60 = vpop.f32.mrf.mxu1 }
 0x172   : > { %1844 = vst [vmem:[%s3329_s29 + $0x20] sm:$0xff] %v1836_v37  ;;  %v1839_v13 = vadd.f32 %v2592_v60, %v1681_v31  ;;  %v1804_v1 = vpop.f32.mrf.mxu0 }
 0x173   : > { %1843 = vst [vmem:[%s3329_s29 + $0x18] sm:$0xff] %v1835_v48  ;;  %v1833_v7 = vadd.f32 %v1804_v1, %v1675_v45  ;;  %v1820_v2 = vpop.f32.mrf.mxu1 }
 0x174   : > { %1847 = vst [vmem:[%s3329_s29 + $0x38] sm:$0xff] %v1839_v13  ;;  %v1837_v36 = vadd.f32 %v1820_v2, %v1679_v11 }
 0x175   : > { %1841 = vst [vmem:[%s3329_s29 + $0x8] sm:$0xff] %v1833_v7  ;;  %v1848_v19 = vadd.f32 %v1833_v7, %v1832_v22 }
 0x176   : > { %1845 = vst [vmem:[%s3329_s29 + $0x28] sm:$0xff] %v1837_v36 }
 0x177   : > { %v1849_v27 = vadd.f32 %v1848_v19, %v1834_v43 }
 0x179   : > { %v1850_v35 = vadd.f32 %v1849_v27, %v1835_v48 }
 0x17b   : > { %v1851_v39 = vadd.f32 %v1850_v35, %v1836_v37 }
 0x17d   : > { %v1852_v9 = vadd.f32 %v1851_v39, %v1837_v36 }
 0x17f   : > { %v1853_v46 = vadd.f32 %v1852_v9, %v1838_v61 }
 0x181   : > { %v1854_v29 = vadd.f32 %v1853_v46, %v1839_v13 }
 0x183   : > { %v1855_v62 = vrot.slane %v1854_v29, 4 }
 0x185   : > { %v1856_v5 = vadd.f32 %v1855_v62, %v1854_v29 }
 0x187   : > { %v1857_v55 = vrot.slane %v1856_v5, 2 }
 0x189   : > { %v1858_v63 = vadd.f32 %v1857_v55, %v1856_v5 }
 0x18b   : > { %v1859_v25 = vrot.slane %v1858_v63, 1 }
 0x18d   : > { %v1860_v14 = vadd.f32 %v1859_v25, %v1858_v63 }
 0x18f   : > { %v1861_v21 = vmul.f32 0.015625, %v1860_v14 }
 0x191   : > { %v1862_v0 = vsub.f32 %v1832_v22, %v1861_v21  ;;  %v1863_v18 = vsub.f32 %v1833_v7, %v1861_v21  ;;  %v1864_v30 = vsub.f32 %v1834_v43, %v1861_v21  ;;  %v1865_v32 = vsub.f32 %v1835_v48, %v1861_v21 }
 0x192   : > { %v1866_v41 = vsub.f32 %v1836_v37, %v1861_v21  ;;  %v1867_v50 = vsub.f32 %v1837_v36, %v1861_v21  ;;  %v1868_v38 = vsub.f32 %v1838_v61, %v1861_v21  ;;  %v1869_v54 = vsub.f32 %v1839_v13, %v1861_v21 }
 0x193   : > { %v1870_v34 = vmul.f32 %v1862_v0, %v1862_v0  ;;  %v1871_v40 = vmul.f32 %v1863_v18, %v1863_v18  ;;  %v1872_v47 = vmul.f32 %v1864_v30, %v1864_v30  ;;  %v1873_v56 = vmul.f32 %v1865_v32, %v1865_v32 }
 0x194   : > { %v1874_v16 = vmul.f32 %v1866_v41, %v1866_v41  ;;  %v1875_v57 = vmul.f32 %v1867_v50, %v1867_v50  ;;  %v1876_v17 = vmul.f32 %v1868_v38, %v1868_v38  ;;  %v1877_v20 = vmul.f32 %v1869_v54, %v1869_v54 }
 0x195   : > { %v1878_v26 = vadd.f32 %v1871_v40, %v1870_v34 }
 0x197   : > { %v1879_v44 = vadd.f32 %v1878_v26, %v1872_v47 }
 0x199   : > { %v1880_v59 = vadd.f32 %v1879_v44, %v1873_v56 }
 0x19b   : > { %v1881_v49 = vadd.f32 %v1880_v59, %v1874_v16 }
 0x19d   : > { %v1882_v12 = vadd.f32 %v1881_v49, %v1875_v57 }
 0x19f   : > { %v1883_v51 = vadd.f32 %v1882_v12, %v1876_v17 }
 0x1a1   : > { %v1884_v8 = vadd.f32 %v1883_v51, %v1877_v20 }
 0x1a3   : > { %v1885_v33 = vrot.slane %v1884_v8, 4 }
 0x1a5   : > { %v1886_v15 = vadd.f32 %v1885_v33, %v1884_v8 }
 0x1a7   : > { %v1887_v23 = vrot.slane %v1886_v15, 2 }
 0x1a9   : > { %v1888_v58 = vadd.f32 %v1887_v23, %v1886_v15 }
 0x1ab   : > { %v1889_v43 = vrot.slane %v1888_v58, 1 }
 0x1ad   : > { %v1890_v52 = vadd.f32 %v1889_v43, %v1888_v58 }
 0x1af   : > { %v1892_v6 = vsel %vm1891_vm2, %v1860_v14, %v1890_v52 }
 0x1b0   : > { %v1894_v4 = vsel %vm1893_vm5, %v1892_v6, 0.0 }
 0x1b1   : > { %1895 = vst [vmem:[%s238_s6] sm:$0xff] %v1894_v4 }
 0x1b2 PF: > { %s16_s18 = sadd.s32 1, %s2696_s18  }
 0x1b3   : > { %p13_p5 = scmp.ge.s32.totalorder %s16_s18, 4  }
 0x1b5   :  { %15 = sbr.rel (!%p13_p5) target bundleno = 1 (0x1), region = 86 }

</bundles_post_ra>
